<compile_context>
chip_gen: v5e
topology: v5e:2x2
jax: 0.10.0
libtpu: 0.0.40
codegen_flags: <defaults>
</compile_context>

<pallas_src>
import functools

import jax
import jax.numpy as jnp
import numpy as np
from jax.experimental import pallas as pl
from jax.experimental.pallas import tpu as pltpu

IN_CH = 64
OUT_CH = 32
HEADS = 2
NEG_SLOPE = 0.2
LANES = 128


def gat_kernel(h_ref, asrc_ref, adst_ref, mask_ref, b_ref, o_ref):
    """One row-tile of target nodes.

    h_ref:    [HEADS, N_pad, OUT_CH] bf16  projected node features (resident)
    asrc_ref: [HEADS, N_pad]         f32   a_src[h, j] = <h_j, att_src_h> (resident)
    adst_ref: [TILE_I, HEADS]        f32   a_dst[i, h] = <h_i, att_dst_h> (tile)
    mask_ref: [TILE_I, N_pad]        bf16  additive bias: 0 edge / -1e30 none (tile)
    b_ref:    [1, LANES]             f32   bias padded to 128 lanes (resident)
    o_ref:    [TILE_I, LANES]        f32   output tile (first 64 lanes valid)
    """
    tile_i = o_ref.shape[0]
    adst = adst_ref[...]                                   # [TILE_I, HEADS] f32

    outs = []
    for hd in range(HEADS):
        a_dst = adst[:, hd:hd + 1]                         # [TILE_I, 1]
        a_src = asrc_ref[hd:hd + 1, :]                     # [1, N_pad]

        # e[i, j] = LeakyReLU(a_dst[i] + a_src[j]) + mask[i, j]
        e = a_dst + a_src                                  # [TILE_I, N_pad] f32
        e = jnp.maximum(e, NEG_SLOPE * e)                  # leaky ReLU: 1 mul + 1 max
        e = e + mask_ref[...]                              # bf16 mask, implicit upcast
        e = e - jnp.max(e, axis=-1, keepdims=True)
        p = jnp.exp(e)                                     # [TILE_I, N_pad] f32
        s = jnp.sum(p, axis=-1, keepdims=True)             # [TILE_I, 1] f32

        # Aggregate un-normalized on the bf16-native MXU (f32 accumulation),
        # normalize afterwards (O(N) instead of O(N^2)).
        hh = h_ref[hd]                                     # [N_pad, OUT_CH] bf16
        agg = jnp.dot(p.astype(jnp.bfloat16), hh,
                      preferred_element_type=jnp.float32)  # [TILE_I, OUT_CH]
        outs.append(agg * pl.reciprocal(s))

    # Single lane-dense 128-wide store (heads concatenated + zero pad) + bias.
    pad = jnp.zeros((tile_i, LANES - HEADS * OUT_CH), jnp.float32)
    o_ref[...] = jnp.concatenate(outs + [pad], axis=-1) + b_ref[...]


def _vmem_limit_bytes():
    # ~64 MiB scoped on 128 MiB parts (v5e/v6e), ~48 MiB on v7x (64 MiB / TC).
    try:
        cap = pltpu.get_tpu_info().vmem_capacity_bytes
    except Exception:
        cap = 64 * 1024 * 1024
    return min(64 * 1024 * 1024, (3 * cap) // 4)


@functools.partial(jax.jit, static_argnames=("num_nodes",))
def tiny_gnn_forward(x, edge_index, w, att_src, att_dst, bias, *, num_nodes):
    n = num_nodes
    # Row tile of target nodes; pad N so the mask lane dim is 128-aligned and
    # the tile divides it evenly.
    tile_i = 256 if n > 256 else 128
    n_pad = ((n + tile_i - 1) // tile_i) * tile_i

    # --- glue: projection + attention dot products, hoisted to plain XLA
    # (tiny [N,64]x[64,64] GEMM).  The kernel receives them as resident inputs.
    h = x @ w                                               # [n, H*C] f32
    h3 = h.reshape(n, HEADS, OUT_CH)
    a_src = jnp.einsum("nhc,hc->hn", h3, att_src)           # [H, n] f32
    a_dst = jnp.einsum("nhc,hc->nh", h3, att_dst)           # [n, H] f32

    h_pad = jnp.zeros((HEADS, n_pad, OUT_CH), jnp.bfloat16)
    h_pad = h_pad.at[:, :n, :].set(
        jnp.transpose(h3, (1, 0, 2)).astype(jnp.bfloat16))  # bf16 MXU operand
    asrc_pad = jnp.zeros((HEADS, n_pad), jnp.float32).at[:, :n].set(a_src)
    adst_pad = jnp.zeros((n_pad, HEADS), jnp.float32).at[:n, :].set(a_dst)
    bias_pad = jnp.zeros((1, LANES), jnp.float32).at[:, :HEADS * OUT_CH].set(
        bias.reshape(1, -1))

    # --- glue: dense additive attention-bias mask from edge_index.
    # edge_index row 0 = source, row 1 = target; adj[i, j]=1 iff edge j -> i.
    # TODO(synk): int8/bit-packed adjacency + source-column blocking with
    # online softmax for large graphs (bounds O(N^2) HBM stream and VMEM).
    src, dst = edge_index[0], edge_index[1]
    adj = jnp.zeros((n_pad, n_pad), jnp.bool_).at[dst, src].set(True)
    idx = jnp.arange(n)
    adj = adj.at[idx, idx].set(True)              # self-loops (real nodes only)
    mask = jnp.where(adj, 0.0, -1e30).astype(jnp.bfloat16)

    grid = (n_pad // tile_i,)
    out = pl.pallas_call(
        gat_kernel,
        out_shape=jax.ShapeDtypeStruct((n_pad, LANES), jnp.float32),
        grid=grid,
        in_specs=[
            pl.BlockSpec((HEADS, n_pad, OUT_CH), lambda i: (0, 0, 0)),  # h (resident)
            pl.BlockSpec((HEADS, n_pad), lambda i: (0, 0)),             # a_src (resident)
            pl.BlockSpec((tile_i, HEADS), lambda i: (i, 0)),            # a_dst (tile)
            pl.BlockSpec((tile_i, n_pad), lambda i: (i, 0)),            # mask (tile, bf16)
            pl.BlockSpec((1, LANES), lambda i: (0, 0)),                 # bias
        ],
        out_specs=pl.BlockSpec((tile_i, LANES), lambda i: (i, 0)),
        compiler_params=pltpu.CompilerParams(
            # Projection is hoisted out, so row tiles are fully independent:
            # "parallel" lets v7x shard them across both TensorCores.
            dimension_semantics=("parallel",),
            vmem_limit_bytes=_vmem_limit_bytes()),
    )(h_pad, asrc_pad, adst_pad, mask, bias_pad)
    return out[:n, :HEADS * OUT_CH]


def _reference(x, edge_index, w, att_src, att_dst, bias, num_nodes):
    """Pure-JAX dense f32 reference of PyG GATConv semantics (for validation)."""
    n = num_nodes
    src, dst = edge_index[0], edge_index[1]
    adj = jnp.zeros((n, n), jnp.float32).at[dst, src].set(1.0)
    adj = adj.at[jnp.arange(n), jnp.arange(n)].set(1.0)
    h = x @ w                                   # [N, H*C]
    h = h.reshape(n, HEADS, OUT_CH)             # [N, H, C]
    a_src = jnp.einsum("nhc,hc->nh", h, att_src)
    a_dst = jnp.einsum("nhc,hc->nh", h, att_dst)
    e = a_dst[:, None, :] + a_src[None, :, :]   # [i, j, h]
    e = jnp.where(e > 0, e, NEG_SLOPE * e)
    e = jnp.where(adj[:, :, None] > 0.5, e, -1e30)
    e = e - jnp.max(e, axis=1, keepdims=True)
    p = jnp.exp(e)
    alpha = p / jnp.sum(p, axis=1, keepdims=True)
    out = jnp.einsum("ijh,jhc->ihc", alpha, h).reshape(n, HEADS * OUT_CH)
    return out + bias.reshape(1, -1)


if __name__ == "__main__":
    N = 16  # number of graph nodes

    key = jax.random.PRNGKey(0)
    k_x, k_w, k_as, k_ad = jax.random.split(key, 4)

    # Deterministic synthetic inputs / parameters.
    x = jax.random.normal(k_x, (N, IN_CH), dtype=jnp.float32)

    # Ring graph: i -> i+1 and i+1 -> i (no duplicate edges).
    srcs = np.concatenate([np.arange(N), (np.arange(N) + 1) % N])
    dsts = np.concatenate([(np.arange(N) + 1) % N, np.arange(N)])
    edge_index = jnp.asarray(np.stack([srcs, dsts]), dtype=jnp.int32)  # [2, E]

    # GATConv parameters (glorot-ish scale, bias zeros as in PyG init).
    w = jax.random.normal(k_w, (IN_CH, HEADS * OUT_CH), dtype=jnp.float32) * 0.1
    att_src = jax.random.normal(k_as, (HEADS, OUT_CH), dtype=jnp.float32) * 0.1
    att_dst = jax.random.normal(k_ad, (HEADS, OUT_CH), dtype=jnp.float32) * 0.1
    bias = jnp.zeros((1, HEADS * OUT_CH), dtype=jnp.float32)

    out = tiny_gnn_forward(x, edge_index, w, att_src, att_dst, bias, num_nodes=N)
    out = jax.block_until_ready(out)

    ref = _reference(x, edge_index, w, att_src, att_dst, bias, N)
    # bf16 MXU operands (p, h) loosen the match vs. the pure-f32 reference.
    np.testing.assert_allclose(np.asarray(out), np.asarray(ref),
                               rtol=2e-2, atol=1e-2)
    assert out.shape == (N, HEADS * OUT_CH) and out.dtype == jnp.float32

    print("KERNEL_OK")
</pallas_src>

<mosaic_0001>
module attributes {stable_mosaic.version = 11 : i64} {
  func.func @gat_kernel(%arg0: i32, %arg1: memref<2x128x32xbf16, #tpu.memory_space<vmem>>, %arg2: memref<2x128xf32, #tpu.memory_space<vmem>>, %arg3: memref<128x2xf32, #tpu.memory_space<vmem>>, %arg4: memref<128x128xbf16, #tpu.memory_space<vmem>>, %arg5: memref<1x128xf32, #tpu.memory_space<vmem>>, %arg6: memref<128x128xf32, #tpu.memory_space<vmem>>) attributes {dimension_semantics = [#tpu.dimension_semantics<parallel>], iteration_bounds = array<i64: 1>, scalar_prefetch = 0 : i64, scratch_operands = 0 : i64, tpu.core_type = #tpu.core_type<tc>, window_params = [{pipeline_mode = #tpu.pipeline_mode<synchronous>, transform_indices = @transform_0, window_bounds = array<i64: 2, 128, 32>}, {pipeline_mode = #tpu.pipeline_mode<synchronous>, transform_indices = @transform_1, window_bounds = array<i64: 2, 128>}, {transform_indices = @transform_2, window_bounds = array<i64: 128, 2>}, {transform_indices = @transform_3, window_bounds = array<i64: 128, 128>}, {pipeline_mode = #tpu.pipeline_mode<synchronous>, transform_indices = @transform_4, window_bounds = array<i64: 1, 128>}, {transform_indices = @transform_5, window_bounds = array<i64: 128, 128>}]} {
    %c0 = arith.constant 0 : index
    %c0_0 = arith.constant 0 : index
    %0 = vector.load %arg3[%c0, %c0_0] : memref<128x2xf32, #tpu.memory_space<vmem>>, vector<128x2xf32>
    %1 = vector.extract_strided_slice %0 {offsets = [0, 0], sizes = [128, 1], strides = [1, 1]} : vector<128x2xf32> to vector<128x1xf32>
    %c0_1 = arith.constant 0 : index
    %c0_2 = arith.constant 0 : index
    %2 = vector.load %arg2[%c0_1, %c0_2] : memref<2x128xf32, #tpu.memory_space<vmem>>, vector<1x128xf32>
    %3 = vector.broadcast %1 : vector<128x1xf32> to vector<128x128xf32>
    %4 = vector.broadcast %2 : vector<1x128xf32> to vector<128x128xf32>
    %5 = arith.addf %3, %4 : vector<128x128xf32>
    %cst = arith.constant 2.000000e-01 : f32
    %6 = vector.broadcast %cst : f32 to vector<128x128xf32>
    %7 = arith.mulf %6, %5 : vector<128x128xf32>
    %8 = arith.maximumf %5, %7 : vector<128x128xf32>
    %c0_3 = arith.constant 0 : index
    %c0_4 = arith.constant 0 : index
    %9 = vector.load %arg4[%c0_3, %c0_4] : memref<128x128xbf16, #tpu.memory_space<vmem>>, vector<128x128xbf16>
    %10 = arith.extf %9 : vector<128x128xbf16> to vector<128x128xf32>
    %11 = arith.addf %8, %10 : vector<128x128xf32>
    %cst_5 = arith.constant dense<0xFF800000> : vector<128xf32>
    %12 = vector.multi_reduction <maximumf>, %11, %cst_5 [1] : vector<128x128xf32> to vector<128xf32>
    %13 = vector.shape_cast %12 : vector<128xf32> to vector<128x1xf32>
    %14 = vector.broadcast %13 : vector<128x1xf32> to vector<128x128xf32>
    %15 = arith.subf %11, %14 : vector<128x128xf32>
    %16 = math.exp %15 : vector<128x128xf32>
    %cst_6 = arith.constant dense<0.000000e+00> : vector<128xf32>
    %17 = vector.multi_reduction <add>, %16, %cst_6 [1] : vector<128x128xf32> to vector<128xf32>
    %18 = vector.shape_cast %17 : vector<128xf32> to vector<128x1xf32>
    %c0_7 = arith.constant 0 : index
    %c0_8 = arith.constant 0 : index
    %c0_9 = arith.constant 0 : index
    %19 = vector.load %arg1[%c0_7, %c0_8, %c0_9] : memref<2x128x32xbf16, #tpu.memory_space<vmem>>, vector<1x128x32xbf16>
    %20 = vector.shape_cast %19 : vector<1x128x32xbf16> to vector<128x32xbf16>
    %21 = arith.truncf %16 : vector<128x128xf32> to vector<128x128xbf16>
    %cst_10 = arith.constant dense<0.000000e+00> : vector<128x32xf32>
    %22 = tpu.matmul %21, %20, %cst_10 {dimension_numbers = #tpu.dot_dimension_numbers<[1], [0], [0], [1], [0, 0, 1, 1], [], []>} : vector<128x128xbf16>, vector<128x32xbf16>, vector<128x32xf32> -> vector<128x32xf32>
    %23 = tpu.reciprocal %18 : vector<128x1xf32> -> vector<128x1xf32>
    %24 = vector.broadcast %23 : vector<128x1xf32> to vector<128x32xf32>
    %25 = arith.mulf %22, %24 : vector<128x32xf32>
    %26 = vector.extract_strided_slice %0 {offsets = [0, 1], sizes = [128, 1], strides = [1, 1]} : vector<128x2xf32> to vector<128x1xf32>
    %c1 = arith.constant 1 : index
    %c0_11 = arith.constant 0 : index
    %27 = vector.load %arg2[%c1, %c0_11] : memref<2x128xf32, #tpu.memory_space<vmem>>, vector<1x128xf32>
    %28 = vector.broadcast %26 : vector<128x1xf32> to vector<128x128xf32>
    %29 = vector.broadcast %27 : vector<1x128xf32> to vector<128x128xf32>
    %30 = arith.addf %28, %29 : vector<128x128xf32>
    %cst_12 = arith.constant 2.000000e-01 : f32
    %31 = vector.broadcast %cst_12 : f32 to vector<128x128xf32>
    %32 = arith.mulf %31, %30 : vector<128x128xf32>
    %33 = arith.maximumf %30, %32 : vector<128x128xf32>
    %c0_13 = arith.constant 0 : index
    %c0_14 = arith.constant 0 : index
    %34 = vector.load %arg4[%c0_13, %c0_14] : memref<128x128xbf16, #tpu.memory_space<vmem>>, vector<128x128xbf16>
    %35 = arith.extf %34 : vector<128x128xbf16> to vector<128x128xf32>
    %36 = arith.addf %33, %35 : vector<128x128xf32>
    %cst_15 = arith.constant dense<0xFF800000> : vector<128xf32>
    %37 = vector.multi_reduction <maximumf>, %36, %cst_15 [1] : vector<128x128xf32> to vector<128xf32>
    %38 = vector.shape_cast %37 : vector<128xf32> to vector<128x1xf32>
    %39 = vector.broadcast %38 : vector<128x1xf32> to vector<128x128xf32>
    %40 = arith.subf %36, %39 : vector<128x128xf32>
    %41 = math.exp %40 : vector<128x128xf32>
    %cst_16 = arith.constant dense<0.000000e+00> : vector<128xf32>
    %42 = vector.multi_reduction <add>, %41, %cst_16 [1] : vector<128x128xf32> to vector<128xf32>
    %43 = vector.shape_cast %42 : vector<128xf32> to vector<128x1xf32>
    %c1_17 = arith.constant 1 : index
    %c0_18 = arith.constant 0 : index
    %c0_19 = arith.constant 0 : index
    %44 = vector.load %arg1[%c1_17, %c0_18, %c0_19] : memref<2x128x32xbf16, #tpu.memory_space<vmem>>, vector<1x128x32xbf16>
    %45 = vector.shape_cast %44 : vector<1x128x32xbf16> to vector<128x32xbf16>
    %46 = arith.truncf %41 : vector<128x128xf32> to vector<128x128xbf16>
    %cst_20 = arith.constant dense<0.000000e+00> : vector<128x32xf32>
    %47 = tpu.matmul %46, %45, %cst_20 {dimension_numbers = #tpu.dot_dimension_numbers<[1], [0], [0], [1], [0, 0, 1, 1], [], []>} : vector<128x128xbf16>, vector<128x32xbf16>, vector<128x32xf32> -> vector<128x32xf32>
    %48 = tpu.reciprocal %43 : vector<128x1xf32> -> vector<128x1xf32>
    %49 = vector.broadcast %48 : vector<128x1xf32> to vector<128x32xf32>
    %50 = arith.mulf %47, %49 : vector<128x32xf32>
    %cst_21 = arith.constant 0.000000e+00 : f32
    %51 = vector.broadcast %cst_21 : f32 to vector<128x64xf32>
    %52 = tpu.concatenate %25, %50, %51 in 1 : vector<128x32xf32>, vector<128x32xf32>, vector<128x64xf32> -> vector<128x128xf32>
    %c0_22 = arith.constant 0 : index
    %c0_23 = arith.constant 0 : index
    %53 = vector.load %arg5[%c0_22, %c0_23] : memref<1x128xf32, #tpu.memory_space<vmem>>, vector<1x128xf32>
    %54 = vector.broadcast %53 : vector<1x128xf32> to vector<128x128xf32>
    %55 = arith.addf %52, %54 : vector<128x128xf32>
    %c0_24 = arith.constant 0 : index
    %c0_25 = arith.constant 0 : index
    %56 = vector.load %arg6[%c0_24, %c0_25] : memref<128x128xf32, #tpu.memory_space<vmem>>, vector<128x128xf32>
    tpu.vector_store %arg6[%c0_24, %c0_25], %55 {strides = array<i32>} : memref<128x128xf32, #tpu.memory_space<vmem>>, vector<128x128xf32>,
    return
  }
  func.func @transform_0(%arg0: i32) -> (i32, i32, i32) {
    %c0_i32 = arith.constant 0 : i32
    %c0_i32_0 = arith.constant 0 : i32
    %c0_i32_1 = arith.constant 0 : i32
    %c0_i32_2 = arith.constant 0 : i32
    return %c0_i32, %c0_i32_0, %c0_i32_1 : i32, i32, i32
  }
  func.func @transform_1(%arg0: i32) -> (i32, i32) {
    %c0_i32 = arith.constant 0 : i32
    %c0_i32_0 = arith.constant 0 : i32
    %c0_i32_1 = arith.constant 0 : i32
    return %c0_i32, %c0_i32_0 : i32, i32
  }
  func.func @transform_2(%arg0: i32) -> (i32, i32) {
    %c0_i32 = arith.constant 0 : i32
    %c0_i32_0 = arith.constant 0 : i32
    return %arg0, %c0_i32 : i32, i32
  }
  func.func @transform_3(%arg0: i32) -> (i32, i32) {
    %c0_i32 = arith.constant 0 : i32
    %c0_i32_0 = arith.constant 0 : i32
    return %arg0, %c0_i32 : i32, i32
  }
  func.func @transform_4(%arg0: i32) -> (i32, i32) {
    %c0_i32 = arith.constant 0 : i32
    %c0_i32_0 = arith.constant 0 : i32
    %c0_i32_1 = arith.constant 0 : i32
    return %c0_i32, %c0_i32_0 : i32, i32
  }
  func.func @transform_5(%arg0: i32) -> (i32, i32) {
    %c0_i32 = arith.constant 0 : i32
    %c0_i32_0 = arith.constant 0 : i32
    return %arg0, %c0_i32 : i32, i32
  }
}

</mosaic_0001>

<bundles_post_ra>
// kernel: tiny_gnn_forward.1
= control target key start
LH: loop header
LB: loop body
LE: loop exit
PB: predicated region body
PF: predicated region fallthrough
CT: control target
= control target key end

     0   :  { %v1720_v0 = vmov 0   ;;  %v1721_v40 = vmov 1   ;;  %s2977_s2 = inlined_call_operand.vmem [shape: f32[128,2], index: 2, kind: input, shape index: {}]   ;;  %s2978_s1 = inlined_call_operand.vmem [shape: f32[2,128], index: 1, kind: input, shape index: {}]   ;;  %s2979_s3 = inlined_call_operand.vmem [shape: bf16[128,128], index: 3, kind: input, shape index: {}]   ;;  %s2980_s0 = inlined_call_operand.vmem [shape: bf16[2,128,32], index: 0, kind: input, shape index: {}]   ;;  %s2981_s4 = inlined_call_operand.vmem [shape: f32[1,128], index: 4, kind: input, shape index: {}]   ;;  %s2982_s5 = inlined_call_operand.vmem [shape: f32[128,128], index: 5, kind: output, shape index: {}]  }
   0x1   :  { %1585 = vset.pattern.permute.xlu2 %v1720_v0  ;;  %1584 = vset.pattern.permute.xlu1 %v1720_v0  ;;  %v1756_v1 = vld [vmem:[%s2977_s2 + $0x20] sm:$0xff]  ;;  %v1761_v2 = vld [vmem:[%s2977_s2 + $0x10] sm:$0xff]  ;;  %v1774_v4 = vld [vmem:[%s2977_s2 + $0x28] sm:$0xff] }
   0x2   :  { %v1766_v3 = vld [vmem:[%s2977_s2] sm:$0xff]  ;;  %1583 = vset.pattern.permute.xlu0 %v1720_v0  ;;  %59 = vperm.xlu2 %1585, %v1756_v1   ;;  %v1779_v5 = vld [vmem:[%s2977_s2 + $0x18] sm:$0xff]  ;;  %v1784_v6 = vld [vmem:[%s2977_s2 + $0x8] sm:$0xff] }
   0x3   :  { %49 = vperm.xlu1 %1584, %v1761_v2   ;;  %39 = vperm.xlu0 %1583, %v1766_v3   ;;  %v1792_v7 = vld [vmem:[%s2977_s2 + $0x40] sm:$0xff]  ;;  %v1797_v8 = vld [vmem:[%s2977_s2 + $0x38] sm:$0xff]  ;;  %v1802_v9 = vld [vmem:[%s2977_s2 + $0x30] sm:$0xff] }
   0x4   :  { %v1810_v10 = vld [vmem:[%s2977_s2 + $0x58] sm:$0xff]  ;;  %v1815_v11 = vld [vmem:[%s2977_s2 + $0x50] sm:$0xff]  ;;  %v1820_v12 = vld [vmem:[%s2977_s2 + $0x48] sm:$0xff] }
   0x5   :  { %v1828_v13 = vld [vmem:[%s2977_s2 + $0x70] sm:$0xff]  ;;  %v1833_v14 = vld [vmem:[%s2977_s2 + $0x68] sm:$0xff]  ;;  %v1838_v15 = vld [vmem:[%s2977_s2 + $0x60] sm:$0xff] }
   0x6   :  { %v1846_v16 = vld [vmem:[%s2977_s2 + $0x78] sm:$0xff]  ;;  %v1852_v17 = vld [vmem:[%s2978_s1] ss:$0 sm:$0xff]  ;;  %v1857_v18 = vld [vmem:[%s2979_s3 + $0x8] sm:$0xff]  }
   0x7   :  { %v1862_v21 = vld [vmem:[%s2979_s3] sm:$0xff]   ;;  %v1531_v25 = vunpack.c.l.bf16 %v1857_v18  ;;  %v1880_v37 = vld [vmem:[%s2979_s3 + $0x10] sm:$0xff]   ;;  %v1899_v51 = vld [vmem:[%s2979_s3 + $0x18] sm:$0xff]   ;;  %v1532_v54 = vunpack.c.h.bf16 %v1857_v18 }
   0x8   :  { %v1527_v29 = vunpack.c.l.bf16 %v1862_v21  ;;  %v1528_v43 = vunpack.c.h.bf16 %v1862_v21  ;;  %v1535_v44 = vunpack.c.l.bf16 %v1880_v37  ;;  %v1539_v58 = vunpack.c.l.bf16 %v1899_v51 }
   0xa   :  { %64 = vperm.xlu2 %1585, %v1774_v4  }
   0xb   :  { %54 = vperm.xlu1 %1584, %v1779_v5   ;;  %44 = vperm.xlu0 %1583, %v1784_v6  }
  0x12   :  { %79 = vperm.xlu2 %1585, %v1792_v7  }
  0x13   :  { %74 = vperm.xlu1 %1584, %v1797_v8   ;;  %69 = vperm.xlu0 %1583, %v1802_v9  }
  0x1a   :  { %94 = vperm.xlu2 %1585, %v1810_v10  }
  0x1b   :  { %89 = vperm.xlu1 %1584, %v1815_v11   ;;  %84 = vperm.xlu0 %1583, %v1820_v12  }
  0x22   :  { %109 = vperm.xlu2 %1585, %v1828_v13  }
  0x23   :  { %104 = vperm.xlu1 %1584, %v1833_v14   ;;  %99 = vperm.xlu0 %1583, %v1838_v15  }
  0x2a   :  { %1588 = vset.pattern.permute.xlu2 %v1721_v40 }
  0x2b   :  { %114 = vperm.xlu0 %1583, %v1846_v16   ;;  %1587 = vset.pattern.permute.xlu1 %v1721_v40 }
  0x33   :  { %1586 = vset.pattern.permute.xlu0 %v1721_v40 }
  0x5c   :  { %v60_v24 = vpop.permute.xlu2 %59 }
  0x5d   :  { %v122_v26 = vadd.f32 %v1852_v17, %v60_v24 }
  0x5f   :  { %v138_v32 = vmul.f32 0.2, %v122_v26 }
  0x61   :  { %v154_v41 = vmax.f32 %v122_v26, %v138_v32 }
  0x63   :  { %v1894_v48 = vadd.f32 %v1535_v44, %v154_v41 }
  0x64   :  { %v65_v55 = vpop.permute.xlu2 %64 }
  0x65   :  { %v123_v56 = vadd.f32 %v1852_v17, %v65_v55 }
  0x67   :  { %v139_v61 = vmul.f32 0.2, %v123_v56 }
  0x75   :  { %v50_v19 = vpop.permute.xlu1 %49  ;;  %v40_v20 = vpop.permute.xlu0 %39 }
  0x76   :  { %v120_v22 = vadd.f32 %v1852_v17, %v50_v19  ;;  %v118_v23 = vadd.f32 %v1852_v17, %v40_v20  ;;  %v1921_v19 = vld [vmem:[%s2979_s3 + $0x28] sm:$0xff]   ;;  %v155_v20 = vmax.f32 %v123_v56, %v139_v61 }
  0x77   :  { %v1547_v24 = vunpack.c.l.bf16 %v1921_v19 }
  0x78   :  { %v136_v27 = vmul.f32 0.2, %v120_v22  ;;  %v134_v28 = vmul.f32 0.2, %v118_v23 }
  0x7a   :  { %v152_v30 = vmax.f32 %v120_v22, %v136_v27  ;;  %v150_v31 = vmax.f32 %v118_v23, %v134_v28  ;;  %v1536_v23 = vunpack.c.h.bf16 %v1880_v37 }
  0x7c   :  { %v1871_v33 = vadd.f32 %v1531_v25, %v152_v30  ;;  %v1875_v34 = vadd.f32 %v1527_v29, %v150_v31  ;;  %v1927_v27 = vadd.f32 %v1536_v23, %v155_v20  ;;  %v1516_v30 = vld [vmem:[%s2980_s0 + $0x38] sm:$0xff] }
  0x7d   :  { %v55_v35 = vpop.permute.xlu1 %54  ;;  %v45_v36 = vpop.permute.xlu0 %44  ;;  %398 = vmatpush.bf16.msra.mxu0 %v1516_v30  ;;  %1564 = vmatpush.bf16.msra.mxu2 %v1516_v30 }
  0x7e   :  { %v121_v38 = vadd.f32 %v1852_v17, %v55_v35  ;;  %v119_v39 = vadd.f32 %v1852_v17, %v45_v36  ;;  %218 = vmax.xlane.f32.xlu0 %v1871_v33  ;;  %214 = vmax.xlane.f32.xlu1 %v1875_v34  ;;  %v80_v35 = vpop.permute.xlu2 %79 }
  0x7f   :  { %v126_v36 = vadd.f32 %v1852_v17, %v80_v35 }
  0x80   :  { %v135_v42 = vmul.f32 0.2, %v119_v39  ;;  %v137_v45 = vmul.f32 0.2, %v121_v38 }
  0x82   :  { %v151_v46 = vmax.f32 %v119_v39, %v135_v42  ;;  %v153_v52 = vmax.f32 %v121_v38, %v137_v45  ;;  %v1950_v38 = vld [vmem:[%s2979_s3 + $0x20] sm:$0xff]   ;;  %v1514_v39 = vld [vmem:[%s2980_s0 + $0x28] sm:$0xff] }
  0x83   :  { %v1543_v42 = vunpack.c.l.bf16 %v1950_v38  ;;  %v1513_v45 = vld [vmem:[%s2980_s0 + $0x20] sm:$0xff] }
  0x84   :  { %v1890_v47 = vadd.f32 %v1528_v43, %v151_v46  ;;  %v1909_v60 = vadd.f32 %v1532_v54, %v153_v52  ;;  %v1510_v52 = vld [vmem:[%s2980_s0 + $0x8] sm:$0xff] }
  0x85   :  { %v75_v49 = vpop.permute.xlu1 %74  ;;  %v70_v50 = vpop.permute.xlu0 %69 }
  0x86   :  { %v124_v53 = vadd.f32 %v1852_v17, %v70_v50  ;;  %216 = vmax.xlane.f32.xlu2 %v1890_v47  ;;  %222 = vmax.xlane.f32.xlu1 %v1894_v48  ;;  %v125_v31 = vadd.f32 %v1852_v17, %v75_v49  ;;  %v1512_v49 = vld [vmem:[%s2980_s0 + $0x18] sm:$0xff]  ;;  %v1511_v50 = vld [vmem:[%s2980_s0 + $0x10] sm:$0xff]  ;;  %v1981_v55 = vpop.permute.xlu2 %94 }
  0x88   :  { %v140_v57 = vmul.f32 0.2, %v124_v53  ;;  %v141_v32 = vmul.f32 0.2, %v125_v31 }
  0x8a   :  { %v156_v59 = vmax.f32 %v124_v53, %v140_v57  ;;  %v1509_v53 = vld [vmem:[%s2980_s0] sm:$0xff] }
  0x8c   :  { %v1913_v62 = vadd.f32 %v1539_v58, %v156_v59 }
  0x8d   :  { %v90_v63 = vpop.permute.xlu1 %89  ;;  %v1983_v56 = vpop.permute.xlu0 %84 }
  0x8e   :  { %v128_v0 = vadd.f32 %v1852_v17, %v90_v63  ;;  %226 = vmax.xlane.f32.xlu0 %v1913_v62  ;;  %220 = vmax.xlane.f32.xlu2 %v1909_v60  ;;  %v1989_v59 = vpop.permute.xlu2 %109 }
  0x90   :  { %v144_v22 = vmul.f32 0.2, %v128_v0 }
  0x92   :  { %v160_v26 = vmax.f32 %v128_v0, %v144_v22 }
  0x94   :  { %v1931_v28 = vadd.f32 %v1547_v24, %v160_v26 }
  0x95   :  { %v1985_v57 = vpop.permute.xlu1 %104  ;;  %v1991_v61 = vpop.permute.xlu0 %99 }
  0x96   :  { %224 = vmax.xlane.f32.xlu2 %v1927_v27 }
  0x9f   :  { %725 = vperm.xlu1 %1587, %v1820_v12   ;;  %v157_v12 = vmax.f32 %v125_v31, %v141_v32 }
  0xa2   :  { %721 = vperm.xlu0 %1586, %v1792_v7   ;;  %v1515_v7 = vld [vmem:[%s2980_s0 + $0x30] sm:$0xff] }
  0xa3   :  { %399 = vmatpush.bf16.msra.mxu0 %v1515_v7  ;;  %1565 = vmatpush.bf16.msra.mxu2 %v1515_v7 }
  0xa7   :  { %693 = vperm.xlu1 %1587, %v1784_v6   ;;  %v1540_v6 = vunpack.c.h.bf16 %v1899_v51  ;;  %400 = vmatpush.bf16.msra.mxu0 %v1514_v39 }
  0xa8   :  { %1566 = vmatpush.bf16.msra.mxu2 %v1514_v39 }
  0xa9   :  { %v1957_v40 = vadd.f32 %v1540_v6, %v157_v12 }
  0xab   :  { %401 = vmatpush.bf16.msra.mxu0 %v1513_v45 }
  0xac   :  { %1567 = vmatpush.bf16.msra.mxu2 %v1513_v45 }
  0xae   :  { %689 = vperm.xlu2 %1588, %v1766_v3   ;;  %v142_v3 = vmul.f32 0.2, %v126_v36 }
  0xaf   :  { %402 = vmatpush.bf16.msra.mxu0 %v1512_v49 }
  0xb0   :  { %v158_v41 = vmax.f32 %v126_v36, %v142_v3  ;;  %1568 = vmatpush.bf16.msra.mxu2 %v1512_v49 }
  0xb2   :  { %v1966_v46 = vadd.f32 %v1543_v42, %v158_v41 }
  0xb3   :  { %403 = vmatpush.bf16.msra.mxu0 %v1511_v50 }
  0xb4   :  { %1569 = vmatpush.bf16.msra.mxu2 %v1511_v50 }
  0xb7   :  { %404 = vmatpush.bf16.msra.mxu0 %v1510_v52 }
  0xb8   :  { %1570 = vmatpush.bf16.msra.mxu2 %v1510_v52  ;;  %v1544_v52 = vunpack.c.h.bf16 %v1950_v38 }
  0xbb   :  { %405 = vmatpush.bf16.msra.mxu0 %v1509_v53 }
  0xbc   :  { %1571 = vmatpush.bf16.msra.mxu2 %v1509_v53 }
  0xd1   :  { %228 = vmax.xlane.f32.xlu1 %v1957_v40 }
  0xd7   :  { %230 = vmax.xlane.f32.xlu2 %v1966_v46 }
  0xea   :  { %733 = vperm.xlu1 %1587, %v1810_v10   ;;  %v1998_v10 = vpop.permute.xlu0 %114 }
  0xef   :  { %729 = vperm.xlu2 %1588, %v1815_v11  }
  0xf1   :  { %v215_v63 = vpop.xlane.xlu1 %214 }
  0xf2   :  { %737 = vperm.xlu1 %1587, %v1838_v15   ;;  %v246_v0 = vsub.f32 %v1875_v34, %v215_v63  ;;  %v219_v34 = vpop.xlane.xlu0 %218 }
  0xf4   :  { %v262_v20 = vmul.f32 1.442695, %v246_v0 }
  0xf6   :  { %1592 = vpow2.f32 %v262_v20 }
  0xf7   :  { %697 = vperm.xlu2 %1588, %v1761_v2  }
  0xf9   :  { %v217_v22 = vpop.xlane.xlu2 %216  ;;  %v223_v35 = vpop.xlane.xlu1 %222 }
  0xfa   :  { %v247_v26 = vsub.f32 %v1890_v47, %v217_v22  ;;  %709 = vperm.xlu1 %1587, %v1774_v4   ;;  %v248_v47 = vsub.f32 %v1871_v33, %v219_v34  ;;  %v250_v49 = vsub.f32 %v1894_v48, %v223_v35 }
  0xfc   :  { %v264_v11 = vmul.f32 1.442695, %v247_v26  ;;  %v2002_v15 = vpop.eup %1592  ;;  %v266_v36 = vmul.f32 1.442695, %v248_v47  ;;  %v270_v20 = vmul.f32 1.442695, %v250_v49 }
  0xfe   :  { %1594 = vpow2.f32 %v264_v11 }
  0xff   :  { %741 = vperm.xlu2 %1588, %v1833_v14   ;;  %v2014_v14 = vld [vmem:[%s2978_s1 + $0x1] ss:$0 sm:$0xff] }
 0x101   :  { %v221_v30 = vpop.xlane.xlu2 %220 }
 0x102   :  { %745 = vperm.xlu1 %1587, %v1828_v13   ;;  %v249_v31 = vsub.f32 %v1909_v60, %v221_v30  ;;  %v227_v13 = vpop.xlane.xlu0 %226 }
 0x104   :  { %v2004_v2 = vpop.eup %1594  ;;  %v268_v32 = vmul.f32 1.442695, %v249_v31 }
 0x105   :  { %v342_v4 = vpack.c.bf16 %v2004_v2, %v2002_v15 }
 0x106   :  { %1596 = vpow2.f32 %v268_v32 }
 0x107   :  { %406 = vmatmul.bf16.vlgmr.msra.gmra.mxu0 %v342_v4  ;;  %1598 = vpow2.f32 %v266_v36 }
 0x109   :  { %v225_v60 = vpop.xlane.xlu2 %224 }
 0x10a   :  { %749 = vperm.xlu1 %1587, %v1846_v16   ;;  %v251_v39 = vsub.f32 %v1927_v27, %v225_v60 }
 0x10c   :  { %v2016_v12 = vpop.eup %1596  ;;  %v272_v53 = vmul.f32 1.442695, %v251_v39 }
 0x10d   :  { %v2019_v3 = vpop.eup %1598 }
 0x10e   :  { %v343_v16 = vpack.c.bf16 %v2016_v12, %v2019_v3  ;;  %1600 = vpow2.f32 %v272_v53 }
 0x10f   :  { %1602 = vpow2.f32 %v270_v20 }
 0x111   :  { %v726_v7 = vpop.permute.xlu1 %725  ;;  %v690_v30 = vpop.permute.xlu2 %689 }
 0x112   :  { %v762_v33 = vadd.f32 %v2014_v14, %v726_v7  ;;  %v753_v32 = vadd.f32 %v2014_v14, %v690_v30 }
 0x114   :  { %v778_v41 = vmul.f32 0.2, %v762_v33  ;;  %v722_v45 = vpop.permute.xlu0 %721  ;;  %v2032_v48 = vpop.eup %1600  ;;  %v769_v36 = vmul.f32 0.2, %v753_v32 }
 0x115   :  { %v761_v0 = vadd.f32 %v2014_v14, %v722_v45  ;;  %v2035_v34 = vpop.eup %1602 }
 0x116   :  { %v794_v50 = vmax.f32 %v762_v33, %v778_v41  ;;  %v344_v4 = vpack.c.bf16 %v2032_v48, %v2035_v34  ;;  %v785_v60 = vmax.f32 %v753_v32, %v769_v36  ;;  %v252_v33 = vsub.f32 %v1913_v62, %v227_v13  ;;  %v1524_v32 = vld [vmem:[%s2980_s0 + $0x78] sm:$0xff] }
 0x117   :  { %411 = vmatmul.bf16.gmra.mxu0 %v343_v16  ;;  %v777_v27 = vmul.f32 0.2, %v761_v0  ;;  %1572 = vmatpush.bf16.msra.mxu3 %v1524_v32 }
 0x118   :  { %v2028_v63 = vadd.f32 %v1544_v52, %v794_v50  ;;  %v274_v39 = vmul.f32 1.442695, %v252_v33  ;;  %1002 = vmatpush.bf16.msra.mxu1 %v1524_v32 }
 0x119   :  { %v694_v22 = vpop.permute.xlu1 %693  ;;  %v793_v26 = vmax.f32 %v761_v0, %v777_v27 }
 0x11a   :  { %835 = vmax.xlane.f32.xlu0 %v2028_v63  ;;  %v754_v11 = vadd.f32 %v2014_v14, %v694_v22  ;;  %1604 = vpow2.f32 %v274_v39 }
 0x11b   :  { %v2039_v31 = vadd.f32 %v1543_v42, %v793_v26  ;;  %v2053_v42 = vadd.f32 %v1527_v29, %v785_v60  ;;  %v127_v26 = vadd.f32 %v1852_v17, %v1983_v56  ;;  %v2096_v56 = vld [vmem:[%s2979_s3 + $0x30] sm:$0xff]  }
 0x11c   :  { %v770_v47 = vmul.f32 0.2, %v754_v11  ;;  %v1551_v39 = vunpack.c.l.bf16 %v2096_v56 }
 0x11e   :  { %v786_v35 = vmax.f32 %v754_v11, %v770_v47 }
 0x120   :  { %v2048_v7 = vadd.f32 %v1528_v43, %v786_v35  ;;  %v2063_v29 = vpop.eup %1604  ;;  %v143_v35 = vmul.f32 0.2, %v127_v26 }
 0x127   :  { %416 = vmatmul.bf16.gmra.mxu0 %v344_v4  ;;  %v1548_v4 = vunpack.c.h.bf16 %v1921_v19 }
 0x128   :  { %833 = vmax.xlane.f32.xlu2 %v2039_v31 }
 0x12e   :  { %701 = vperm.xlu0 %1586, %v1779_v5  }
 0x130   :  { %819 = vmax.xlane.f32.xlu2 %v2048_v7 }
 0x134   :  { %817 = vmax.xlane.f32.xlu1 %v2053_v42 }
 0x136   :  { %705 = vperm.xlu0 %1586, %v1756_v1  }
 0x13e   :  { %713 = vperm.xlu0 %1586, %v1802_v9  }
 0x144   :  { %v229_v5 = vpop.xlane.xlu1 %228 }
 0x145   :  { %v253_v41 = vsub.f32 %v1957_v40, %v229_v5  ;;  %v159_v5 = vmax.f32 %v127_v26, %v143_v35 }
 0x147   :  { %v276_v43 = vmul.f32 1.442695, %v253_v41 }
 0x148   :  { %717 = vperm.xlu2 %1588, %v1797_v8  }
 0x149   :  { %1606 = vpow2.f32 %v276_v43 }
 0x14a   :  { %v2061_v21 = vpop.xlane.xlu2 %230 }
 0x14f   :  { %v2065_v16 = vpop.eup %1606 }
 0x150   :  { %v345_v1 = vpack.c.bf16 %v2065_v16, %v2063_v29 }
 0x152   :  { %v730_v9 = vpop.permute.xlu2 %729  ;;  %421 = vmatmul.bf16.gmra.mxu0 %v345_v1 }
 0x153   :  { %v763_v62 = vadd.f32 %v2014_v14, %v730_v9  ;;  %v1523_v9 = vld [vmem:[%s2980_s0 + $0x70] sm:$0xff] }
 0x154   :  { %1573 = vmatpush.bf16.msra.mxu3 %v1523_v9  ;;  %1003 = vmatpush.bf16.msra.mxu1 %v1523_v9 }
 0x155   :  { %v779_v13 = vmul.f32 0.2, %v763_v62 }
 0x157   :  { %v795_v40 = vmax.f32 %v763_v62, %v779_v13  ;;  %v2113_v62 = vadd.f32 %v1544_v52, %v159_v5  ;;  %v1521_v52 = vld [vmem:[%s2980_s0 + $0x60] sm:$0xff] }
 0x158   :  { %v1517_v5 = vld [vmem:[%s2980_s0 + $0x40] sm:$0xff] }
 0x159   :  { %v2072_v45 = vadd.f32 %v1547_v24, %v795_v40  ;;  %v1552_v40 = vunpack.c.h.bf16 %v2096_v56 }
 0x15a   :  { %v698_v8 = vpop.permute.xlu2 %697 }
 0x15b   :  { %v755_v49 = vadd.f32 %v2014_v14, %v698_v8  ;;  %837 = vmax.xlane.f32.xlu1 %v2072_v45  ;;  %v1522_v8 = vld [vmem:[%s2980_s0 + $0x68] sm:$0xff] }
 0x15c   :  { %v734_v50 = vpop.permute.xlu1 %733  ;;  %1574 = vmatpush.bf16.msra.mxu3 %v1522_v8  ;;  %1004 = vmatpush.bf16.msra.mxu1 %v1522_v8 }
 0x15d   :  { %v771_v53 = vmul.f32 0.2, %v755_v49  ;;  %v764_v0 = vadd.f32 %v2014_v14, %v734_v50 }
 0x15f   :  { %v787_v20 = vmax.f32 %v755_v49, %v771_v53  ;;  %v780_v27 = vmul.f32 0.2, %v764_v0  ;;  %v2130_v53 = vld [vmem:[%s2979_s3 + $0x38] sm:$0xff]  }
 0x160   :  { %1575 = vmatpush.bf16.msra.mxu3 %v1521_v52  ;;  %1005 = vmatpush.bf16.msra.mxu1 %v1521_v52  ;;  %v1555_v26 = vunpack.c.l.bf16 %v2130_v53 }
 0x161   :  { %v2079_v22 = vadd.f32 %v1531_v25, %v787_v20  ;;  %v796_v24 = vmax.f32 %v764_v0, %v780_v27  ;;  %v1520_v20 = vld [vmem:[%s2980_s0 + $0x58] sm:$0xff] }
 0x162   :  { %v742_v11 = vpop.permute.xlu2 %741 }
 0x163   :  { %821 = vmax.xlane.f32.xlu1 %v2079_v22  ;;  %v2091_v25 = vadd.f32 %v1548_v4, %v796_v24  ;;  %v766_v36 = vadd.f32 %v2014_v14, %v742_v11 }
 0x164   :  { %v738_v30 = vpop.permute.xlu1 %737  ;;  %1576 = vmatpush.bf16.msra.mxu3 %v1520_v20  ;;  %1006 = vmatpush.bf16.msra.mxu1 %v1520_v20 }
 0x165   :  { %v765_v47 = vadd.f32 %v2014_v14, %v738_v30  ;;  %v782_v41 = vmul.f32 0.2, %v766_v36 }
 0x167   :  { %v781_v60 = vmul.f32 0.2, %v765_v47  ;;  %v798_v13 = vmax.f32 %v766_v36, %v782_v41  ;;  %v1556_v36 = vunpack.c.h.bf16 %v2130_v53  ;;  %v131_v41 = vadd.f32 %v1852_v17, %v1985_v57 }
 0x168   :  { %839 = vmax.xlane.f32.xlu0 %v2091_v25 }
 0x169   :  { %v797_v33 = vmax.f32 %v765_v47, %v781_v60  ;;  %v2120_v49 = vadd.f32 %v1552_v40, %v798_v13  ;;  %v1519_v47 = vld [vmem:[%s2980_s0 + $0x50] sm:$0xff]  ;;  %v1518_v60 = vld [vmem:[%s2980_s0 + $0x48] sm:$0xff]  ;;  %v147_v9 = vmul.f32 0.2, %v131_v41  ;;  %s1722_s0 = smov 32  }
 0x16a   :  { %1577 = vmatpush.bf16.msra.mxu3 %v1519_v47  ;;  %1007 = vmatpush.bf16.msra.mxu1 %v1519_v47 }
 0x16b   :  { %v2103_v43 = vadd.f32 %v1551_v39, %v797_v33  ;;  %v163_v13 = vmax.f32 %v131_v41, %v147_v9 }
 0x16c   :  { %v2105_v1 = vpop.permute.xlu1 %709 }
 0x16d   :  { %841 = vmax.xlane.f32.xlu1 %v2103_v43  ;;  %v2159_v8 = vadd.f32 %v1552_v40, %v163_v13 }
 0x16e   :  { %1578 = vmatpush.bf16.msra.mxu3 %v1518_v60  ;;  %1008 = vmatpush.bf16.msra.mxu1 %v1518_v60 }
 0x170   :  { %232 = vmax.xlane.f32.xlu0 %v2113_v62 }
 0x172   :  { %1579 = vmatpush.bf16.msra.mxu3 %v1517_v5  ;;  %1009 = vmatpush.bf16.msra.mxu1 %v1517_v5 }
 0x174   :  { %v746_v50 = vpop.permute.xlu1 %745 }
 0x175   :  { %v767_v38 = vadd.f32 %v2014_v14, %v746_v50  ;;  %843 = vmax.xlane.f32.xlu1 %v2120_v49 }
 0x177   :  { %v783_v0 = vmul.f32 0.2, %v767_v38 }
 0x179   :  { %v799_v27 = vmax.f32 %v767_v38, %v783_v0 }
 0x17b   :  { %v2138_v24 = vadd.f32 %v1555_v26, %v799_v27 }
 0x17c   :  { %v750_v11 = vpop.permute.xlu1 %749 }
 0x17d   :  { %v768_v30 = vadd.f32 %v2014_v14, %v750_v11 }
 0x17f   :  { %v784_v32 = vmul.f32 0.2, %v768_v30 }
 0x181   :  { %v800_v35 = vmax.f32 %v768_v30, %v784_v32 }
 0x183   :  { %v2150_v33 = vadd.f32 %v1556_v36, %v800_v35 }
 0x185   :  { %847 = vmax.xlane.f32.xlu0 %v2150_v33 }
 0x18d   :  { %234 = vmax.xlane.f32.xlu0 %v1931_v28  ;;  %v836_v50 = vpop.xlane.xlu0 %835 }
 0x18e   :  { %v858_v38 = vsub.f32 %v2028_v63, %v836_v50  ;;  %v758_v50 = vadd.f32 %v2014_v14, %v2105_v1 }
 0x190   :  { %v883_v52 = vmul.f32 1.442695, %v858_v38 }
 0x192   :  { %1608 = vpow2.f32 %v883_v52 }
 0x195   :  { %240 = vmax.xlane.f32.xlu0 %v2159_v8 }
 0x198   :  { %v2167_v32 = vpop.eup %1608 }
 0x19b   :  { %v834_v0 = vpop.xlane.xlu2 %833 }
 0x19c   :  { %v857_v20 = vsub.f32 %v2039_v31, %v834_v0 }
 0x19d   :  { %294 = vadd.xlane.f32.xlu0 %v2002_v15 }
 0x19e   :  { %v881_v57 = vmul.f32 1.442695, %v857_v20 }
 0x1a0   :  { %1610 = vpow2.f32 %v881_v57  ;;  %v702_v27 = vpop.permute.xlu0 %701 }
 0x1a1   :  { %v756_v11 = vadd.f32 %v2014_v14, %v702_v27  ;;  %v129_v27 = vadd.f32 %v1852_v17, %v1981_v55 }
 0x1a3   :  { %v772_v30 = vmul.f32 0.2, %v756_v11  ;;  %v820_v40 = vpop.xlane.xlu2 %819 }
 0x1a4   :  { %v850_v47 = vsub.f32 %v2048_v7, %v820_v40 }
 0x1a5   :  { %v788_v35 = vmax.f32 %v756_v11, %v772_v30 }
 0x1a6   :  { %v2169_v63 = vpop.eup %1610  ;;  %v867_v60 = vmul.f32 1.442695, %v850_v47  ;;  %v145_v47 = vmul.f32 0.2, %v129_v27 }
 0x1a7   :  { %v818_v5 = vpop.xlane.xlu1 %817  ;;  %v2173_v15 = vadd.f32 %v1532_v54, %v788_v35  ;;  %v950_v31 = vpack.c.bf16 %v2167_v32, %v2169_v63  ;;  %v774_v54 = vmul.f32 0.2, %v758_v50 }
 0x1a8   :  { %v849_v41 = vsub.f32 %v2053_v42, %v818_v5  ;;  %v706_v9 = vpop.permute.xlu0 %705  ;;  %1612 = vpow2.f32 %v867_v60  ;;  %v161_v55 = vmax.f32 %v129_v27, %v145_v47  ;;  %v132_v5 = vadd.f32 %v1852_v17, %v1989_v59 }
 0x1a9   :  { %v757_v13 = vadd.f32 %v2014_v14, %v706_v9  ;;  %823 = vmax.xlane.f32.xlu2 %v2173_v15  ;;  %1030 = vmatmul.bf16.vlgmr.msra.gmra.mxu3 %v950_v31  ;;  %v790_v1 = vmax.f32 %v758_v50, %v774_v54 }
 0x1aa   :  { %v865_v7 = vmul.f32 1.442695, %v849_v41  ;;  %v148_v41 = vmul.f32 0.2, %v132_v5 }
 0x1ab   :  { %v773_v38 = vmul.f32 0.2, %v757_v13  ;;  %v2196_v35 = vadd.f32 %v1536_v23, %v790_v1  ;;  %v718_v60 = vpop.permute.xlu2 %717  ;;  %v130_v23 = vadd.f32 %v1852_v17, %v1991_v61 }
 0x1ac   :  { %1614 = vpow2.f32 %v865_v7  ;;  %v760_v31 = vadd.f32 %v2014_v14, %v718_v60  ;;  %v164_v37 = vmax.f32 %v132_v5, %v148_v41 }
 0x1ad   :  { %v789_v18 = vmax.f32 %v757_v13, %v773_v38  ;;  %v146_v7 = vmul.f32 0.2, %v130_v23 }
 0x1ae   :  { %v1613_v0 = vpop.eup %1612  ;;  %v776_v9 = vmul.f32 0.2, %v760_v31  ;;  %v2213_v59 = vadd.f32 %v1555_v26, %v164_v37 }
 0x1af   :  { %v2184_v52 = vadd.f32 %v1535_v44, %v789_v18  ;;  %v162_v19 = vmax.f32 %v130_v23, %v146_v7 }
 0x1b0   :  { %v714_v42 = vpop.permute.xlu0 %713  ;;  %v792_v13 = vmax.f32 %v760_v31, %v776_v9 }
 0x1b1   :  { %v759_v20 = vadd.f32 %v2014_v14, %v714_v42  ;;  %825 = vmax.xlane.f32.xlu1 %v2184_v52  ;;  %v2225_v38 = vadd.f32 %v1551_v39, %v162_v19  ;;  %v254_v42 = vsub.f32 %v1966_v46, %v2061_v21 }
 0x1b2   :  { %v1615_v57 = vpop.eup %1614  ;;  %v2217_v14 = vadd.f32 %v1540_v6, %v792_v13 }
 0x1b3   :  { %v775_v11 = vmul.f32 0.2, %v759_v20  ;;  %897 = vadd.xlane.f32.xlu0 %v1615_v57  ;;  %v946_v30 = vpack.c.bf16 %v1613_v0, %v1615_v57  ;;  %v278_v53 = vmul.f32 1.442695, %v254_v42 }
 0x1b5   :  { %v791_v40 = vmax.f32 %v759_v20, %v775_v11  ;;  %1010 = vmatmul.bf16.vlgmr.msra.gmra.mxu1 %v946_v30 }
 0x1b7   :  { %v2192_v44 = vadd.f32 %v1539_v58, %v791_v40  ;;  %v2205_v58 = vadd.f32 %v1548_v4, %v161_v55  ;;  %v133_v4 = vadd.f32 %v1852_v17, %v1998_v10 }
 0x1b9   :  { %829 = vmax.xlane.f32.xlu2 %v2192_v44  ;;  %827 = vmax.xlane.f32.xlu1 %v2196_v35  ;;  %v149_v61 = vmul.f32 0.2, %v133_v4 }
 0x1bb   :  { %v165_v51 = vmax.f32 %v133_v4, %v149_v61 }
 0x1bd   :  { %v2232_v18 = vadd.f32 %v1556_v36, %v165_v51 }
 0x1c1   :  { %236 = vmax.xlane.f32.xlu2 %v2205_v58  ;;  %845 = vmax.xlane.f32.xlu1 %v2138_v24 }
 0x1c9   :  { %242 = vmax.xlane.f32.xlu2 %v2213_v59  ;;  %831 = vmax.xlane.f32.xlu1 %v2217_v14 }
 0x1ce   :  { %v838_v50 = vpop.xlane.xlu1 %837 }
 0x1cf   :  { %v859_v6 = vsub.f32 %v2072_v45, %v838_v50 }
 0x1d1   :  { %296 = vadd.xlane.f32.xlu2 %v2004_v2  ;;  %238 = vmax.xlane.f32.xlu1 %v2225_v38  ;;  %v885_v10 = vmul.f32 1.442695, %v859_v6 }
 0x1d3   :  { %1616 = vpow2.f32 %v885_v10 }
 0x1d6   :  { %v822_v26 = vpop.xlane.xlu1 %821 }
 0x1d7   :  { %v851_v17 = vsub.f32 %v2079_v22, %v822_v26 }
 0x1d9   :  { %899 = vadd.xlane.f32.xlu2 %v1613_v0  ;;  %244 = vmax.xlane.f32.xlu1 %v2232_v18  ;;  %v869_v2 = vmul.f32 1.442695, %v851_v17  ;;  %v2241_v22 = vpop.eup %1616 }
 0x1db   :  { %v840_v56 = vpop.xlane.xlu0 %839 }
 0x1dc   :  { %v860_v39 = vsub.f32 %v2091_v25, %v840_v56 }
 0x1de   :  { %v887_v54 = vmul.f32 1.442695, %v860_v39 }
 0x1e0   :  { %1618 = vpow2.f32 %v887_v54  ;;  %v842_v45 = vpop.xlane.xlu1 %841 }
 0x1e1   :  { %298 = vadd.xlane.f32.xlu1 %v2019_v3  ;;  %1620 = vpow2.f32 %v869_v2  ;;  %v861_v21 = vsub.f32 %v2103_v43, %v842_v45 }
 0x1e2   :  { %1622 = vpow2.f32 %v278_v53 }
 0x1e3   :  { %v233_v36 = vpop.xlane.xlu0 %232 }
 0x1e4   :  { %v255_v0 = vsub.f32 %v2113_v62, %v233_v36  ;;  %v889_v62 = vmul.f32 1.442695, %v861_v21 }
 0x1e6   :  { %v2243_v20 = vpop.eup %1618  ;;  %v280_v25 = vmul.f32 1.442695, %v255_v0 }
 0x1e7   :  { %v951_v57 = vpack.c.bf16 %v2243_v20, %v2241_v22  ;;  %v1621_v46 = vpop.eup %1620 }
 0x1e8   :  { %1624 = vpow2.f32 %v280_v25  ;;  %v844_v27 = vpop.xlane.xlu1 %843  ;;  %v2249_v11 = vpop.eup %1622 }
 0x1e9   :  { %v862_v3 = vsub.f32 %v2120_v49, %v844_v27  ;;  %901 = vadd.xlane.f32.xlu1 %v1621_v46  ;;  %1035 = vmatmul.bf16.gmra.mxu3 %v951_v57 }
 0x1eb   :  { %v891_v1 = vmul.f32 1.442695, %v862_v3 }
 0x1ed   :  { %1626 = vpow2.f32 %v891_v1 }
 0x1ee   :  { %v2251_v30 = vpop.eup %1624  ;;  %1628 = vpow2.f32 %v889_v62 }
 0x1ef   :  { %v346_v40 = vpack.c.bf16 %v2251_v30, %v2249_v11 }
 0x1f1   :  { %426 = vmatmul.bf16.vlgmr.msra.gmra.mxu2 %v346_v40 }
 0x1f3   :  { %v2255_v47 = vpop.eup %1626 }
 0x1f4   :  { %v2257_v43 = vpop.eup %1628 }
 0x1f5   :  { %v952_v49 = vpack.c.bf16 %v2255_v47, %v2257_v43 }
 0x1f8   :  { %v848_v31 = vpop.xlane.xlu0 %847 }
 0x1f9   :  { %1040 = vmatmul.bf16.gmra.mxu3 %v952_v49  ;;  %v864_v51 = vsub.f32 %v2150_v33, %v848_v31 }
 0x1fb   :  { %v895_v17 = vmul.f32 1.442695, %v864_v51 }
 0x200   :  { %v235_v4 = vpop.xlane.xlu0 %234 }
 0x21c   :  { %v824_v60 = vpop.xlane.xlu2 %823 }
 0x21d   :  { %v852_v55 = vsub.f32 %v2173_v15, %v824_v60 }
 0x21f   :  { %v871_v5 = vmul.f32 1.442695, %v852_v55 }
 0x221   :  { %1630 = vpow2.f32 %v871_v5 }
 0x224   :  { %v826_v41 = vpop.xlane.xlu1 %825 }
 0x225   :  { %v853_v9 = vsub.f32 %v2184_v52, %v826_v41  ;;  %v256_v52 = vsub.f32 %v1931_v28, %v235_v4 }
 0x227   :  { %v1631_v37 = vpop.eup %1630  ;;  %v873_v23 = vmul.f32 1.442695, %v853_v9  ;;  %v282_v10 = vmul.f32 1.442695, %v256_v52 }
 0x228   :  { %903 = vadd.xlane.f32.xlu0 %v1631_v37  ;;  %v947_v13 = vpack.c.bf16 %v1631_v37, %v1621_v46 }
 0x229   :  { %1632 = vpow2.f32 %v873_v23 }
 0x22a   :  { %1015 = vmatmul.bf16.gmra.mxu1 %v947_v13 }
 0x22c   :  { %v830_v7 = vpop.xlane.xlu2 %829  ;;  %v828_v19 = vpop.xlane.xlu1 %827 }
 0x22d   :  { %v855_v50 = vsub.f32 %v2192_v44, %v830_v7  ;;  %v854_v61 = vsub.f32 %v2196_v35, %v828_v19 }
 0x22f   :  { %v1633_v15 = vpop.eup %1632  ;;  %v877_v6 = vmul.f32 1.442695, %v855_v50  ;;  %v875_v26 = vmul.f32 1.442695, %v854_v61 }
 0x230   :  { %905 = vadd.xlane.f32.xlu2 %v1633_v15 }
 0x231   :  { %1634 = vpow2.f32 %v877_v6 }
 0x232   :  { %1636 = vpow2.f32 %v875_v26  ;;  %v1011_v13 = vpop.f32.mrf.mxu1 }
 0x233   :  { %1638 = vpow2.f32 %v895_v17 }
 0x234   :  { %v237_v56 = vpop.xlane.xlu2 %236  ;;  %v846_v39 = vpop.xlane.xlu1 %845  ;;  %1640 = vpow2.f32 %v282_v10 }
 0x235   :  { %v257_v2 = vsub.f32 %v2205_v58, %v237_v56  ;;  %v863_v44 = vsub.f32 %v2138_v24, %v846_v39  ;;  %v241_v58 = vpop.xlane.xlu0 %240 }
 0x236   :  { %v259_v21 = vsub.f32 %v2159_v8, %v241_v58 }
 0x237   :  { %v1635_v54 = vpop.eup %1634  ;;  %v284_v35 = vmul.f32 1.442695, %v257_v2  ;;  %v893_v42 = vmul.f32 1.442695, %v863_v44 }
 0x238   :  { %v1637_v33 = vpop.eup %1636  ;;  %909 = vadd.xlane.f32.xlu0 %v1635_v54  ;;  %v288_v1 = vmul.f32 1.442695, %v259_v21 }
 0x239   :  { %1642 = vpow2.f32 %v284_v35  ;;  %907 = vadd.xlane.f32.xlu1 %v1637_v33  ;;  %v948_v28 = vpack.c.bf16 %v1637_v33, %v1633_v15  ;;  %v1639_v53 = vpop.eup %1638 }
 0x23a   :  { %1644 = vpow2.f32 %v893_v42  ;;  %v1641_v0 = vpop.eup %1640  ;;  %v1013_v52 = vpop.f32.mrf.mxu1 }
 0x23b   :  { %1020 = vmatmul.bf16.gmra.mxu1 %v948_v28 }
 0x23c   :  { %v832_v45 = vpop.xlane.xlu1 %831  ;;  %v243_v8 = vpop.xlane.xlu2 %242 }
 0x23d   :  { %v856_v36 = vsub.f32 %v2217_v14, %v832_v45  ;;  %v2284_v41 = vpop.xlane.xlu0 %294 }
 0x23f   :  { %v1643_v25 = vpop.eup %1642  ;;  %v879_v24 = vmul.f32 1.442695, %v856_v36 }
 0x240   :  { %v1645_v57 = vpop.eup %1644  ;;  %915 = vadd.xlane.f32.xlu0 %v2167_v32  ;;  %v347_v46 = vpack.c.bf16 %v1643_v25, %v1641_v0 }
 0x241   :  { %913 = vadd.xlane.f32.xlu1 %v2169_v63  ;;  %v953_v27 = vpack.c.bf16 %v1639_v53, %v1645_v57  ;;  %1646 = vpow2.f32 %v879_v24 }
 0x242   :  { %431 = vmatmul.bf16.gmra.mxu2 %v347_v46  ;;  %1648 = vpow2.f32 %v288_v1 }
 0x243   :  { %1045 = vmatmul.bf16.gmra.mxu3 %v953_v27  ;;  %v2302_v27 = vpop.f32.mrf.mxu3 }
 0x244   :  { %v239_v3 = vpop.xlane.xlu1 %238  ;;  %v2279_v31 = vpop.xlane.xlu2 %296 }
 0x245   :  { %v258_v14 = vsub.f32 %v2225_v38, %v239_v3 }
 0x247   :  { %v1647_v62 = vpop.eup %1646  ;;  %v286_v40 = vmul.f32 1.442695, %v258_v14 }
 0x248   :  { %921 = vadd.xlane.f32.xlu0 %v2257_v43  ;;  %911 = vadd.xlane.f32.xlu2 %v1647_v62  ;;  %v949_v32 = vpack.c.bf16 %v1647_v62, %v1635_v54  ;;  %v1649_v49 = vpop.eup %1648  ;;  %v260_v43 = vsub.f32 %v2213_v59, %v243_v8 }
 0x249   :  { %919 = vadd.xlane.f32.xlu1 %v2243_v20  ;;  %1650 = vpow2.f32 %v286_v40 }
 0x24a   :  { %v290_v20 = vmul.f32 1.442695, %v260_v43 }
 0x24b   :  { %1025 = vmatmul.bf16.gmra.mxu1 %v949_v32  ;;  %v1033_v62 = vpop.f32.mrf.mxu3 }
 0x24c   :  { %v245_v63 = vpop.xlane.xlu1 %244  ;;  %v900_v9 = vpop.xlane.xlu2 %899 }
 0x24d   :  { %v261_v55 = vsub.f32 %v2232_v18, %v245_v63  ;;  %v1076_v19 = vand.u32 2147483648, %v900_v9  ;;  %vm1070_vm1 = vweird.f32 %v900_v9  ;;  %v1074_v50 = vand.u32 2147483647, %v900_v9 }
 0x24f   :  { %v1651_v60 = vpop.eup %1650  ;;  %v292_v5 = vmul.f32 1.442695, %v261_v55  ;;  %v1077_v61 = vor.u32 1.1754944e-38, %v1076_v19  ;;  %vm1075_vm4 = vcmp.eq.f32.partialorder %v1074_v50, 8.507059e+37 }
 0x250   :  { %927 = vadd.xlane.f32.xlu0 %v1639_v53  ;;  %917 = vadd.xlane.f32.xlu2 %v2241_v22  ;;  %v348_v38 = vpack.c.bf16 %v1649_v49, %v1651_v60 }
 0x251   :  { %925 = vadd.xlane.f32.xlu1 %v1645_v57  ;;  %1652 = vpow2.f32 %v292_v5 }
 0x252   :  { %436 = vmatmul.bf16.gmra.mxu2 %v348_v38  ;;  %1654 = vpow2.f32 %v290_v20 }
 0x253   :  { %1656 = vrcp.f32 %v900_v9 }
 0x254   :  { %v2291_v51 = vpop.xlane.xlu1 %298 }
 0x257   :  { %v1653_v18 = vpop.eup %1652 }
 0x258   :  { %304 = vadd.xlane.f32.xlu0 %v2032_v48  ;;  %923 = vadd.xlane.f32.xlu2 %v2255_v47  ;;  %v1655_v22 = vpop.eup %1654  ;;  %v898_v48 = vpop.xlane.xlu0 %897 }
 0x259   :  { %302 = vadd.xlane.f32.xlu1 %v2035_v34  ;;  %v349_v59 = vpack.c.bf16 %v1653_v18, %v1655_v22  ;;  %v1657_v34 = vpop.eup %1656  ;;  %1658 = vrcp.f32 %v898_v48  ;;  %vm1056_vm5 = vweird.f32 %v898_v48  ;;  %v1060_v26 = vand.u32 2147483647, %v898_v48 }
 0x25a   :  { %v1066_v47 = vmul.f32 %v1657_v34, %v900_v9  ;;  %vm1071_vm0 = vweird.f32 %v1657_v34 }
 0x25b   :  { %vm1072_vm2 = vmor %vm1070_vm1, %vm1071_vm0  ;;  %vm1061_vm7 = vcmp.eq.f32.partialorder %v1060_v26, 8.507059e+37 }
 0x25c   :  { %v1067_v23 = vsub.f32 1.0, %v1066_v47  ;;  %v902_v44 = vpop.xlane.xlu1 %901 }
 0x25d   :  { %1660 = vrcp.f32 %v902_v44  ;;  %v1090_v45 = vand.u32 2147483648, %v902_v44  ;;  %vm1084_vm9 = vweird.f32 %v902_v44  ;;  %v1088_v53 = vand.u32 2147483647, %v902_v44 }
 0x25f   :  { %v1659_v37 = vpop.eup %1658  ;;  %v1091_v58 = vor.u32 1.1754944e-38, %v1090_v45  ;;  %vm1089_vm11 = vcmp.eq.f32.partialorder %v1088_v53, 8.507059e+37 }
 0x260   :  { %310 = vadd.xlane.f32.xlu0 %v2249_v11  ;;  %300 = vadd.xlane.f32.xlu2 %v2016_v12  ;;  %v1068_v11 = vmul.f32 %v1657_v34, %v1067_v23  ;;  %vm1057_vm3 = vweird.f32 %v1659_v37 }
 0x261   :  { %308 = vadd.xlane.f32.xlu1 %v2065_v16  ;;  %v1052_v16 = vmul.f32 %v1659_v37, %v898_v48  ;;  %vm1058_vm6 = vmor %vm1056_vm5, %vm1057_vm3 }
 0x262   :  { %441 = vmatmul.bf16.gmra.mxu2 %v349_v59  ;;  %v1069_v7 = vadd.f32 %v1657_v34, %v1068_v11 }
 0x263   :  { %v1053_v12 = vsub.f32 1.0, %v1052_v16  ;;  %v1661_v54 = vpop.eup %1660 }
 0x264   :  { %v1080_v35 = vmul.f32 %v1661_v54, %v902_v44  ;;  %vm1085_vm8 = vweird.f32 %v1661_v54 }
 0x265   :  { %v1054_v4 = vmul.f32 %v1659_v37, %v1053_v12  ;;  %vm1086_vm10 = vmor %vm1084_vm9, %vm1085_vm8 }
 0x266   :  { %v1081_v42 = vsub.f32 1.0, %v1080_v35 }
 0x267   :  { %v1055_v15 = vadd.f32 %v1659_v37, %v1054_v4 }
 0x268   :  { %316 = vadd.xlane.f32.xlu0 %v1643_v25  ;;  %306 = vadd.xlane.f32.xlu2 %v2063_v29  ;;  %v1073_v29 = vsel %vm1072_vm2, %v1657_v34, %v1069_v7  ;;  %v1082_v33 = vmul.f32 %v1661_v54, %v1081_v42 }
 0x269   :  { %314 = vadd.xlane.f32.xlu1 %v1641_v0  ;;  %v1078_v6 = vsel %vm1075_vm4, %v1077_v61, %v1073_v29  ;;  %v1059_v17 = vsel %vm1058_vm6, %v1659_v37, %v1055_v15 }
 0x26a   :  { %v1276_v10 = vmul.f32 %v1078_v6, %v1013_v52  ;;  %v1083_v28 = vadd.f32 %v1661_v54, %v1082_v33 }
 0x26c   :  { %v1087_v0 = vsel %vm1086_vm10, %v1661_v54, %v1083_v28  ;;  %v2318_v9 = vpop.f32.mrf.mxu3 }
 0x26d   :  { %v1092_v24 = vsel %vm1089_vm11, %v1091_v58, %v1087_v0 }
 0x270   :  { %322 = vadd.xlane.f32.xlu0 %v1655_v22  ;;  %312 = vadd.xlane.f32.xlu2 %v2251_v30  ;;  %v1062_v30 = vand.u32 2147483648, %v898_v48 }
 0x271   :  { %320 = vadd.xlane.f32.xlu1 %v1649_v49 }
 0x272   :  { %v1063_v56 = vor.u32 1.1754944e-38, %v1062_v30 }
 0x274   :  { %v1064_v39 = vsel %vm1061_vm7, %v1063_v56, %v1059_v17  ;;  %v2350_v35 = vpop.f32.mrf.mxu3 }
 0x275   :  { %v1275_v2 = vmul.f32 %v1064_v39, %v1011_v13 }
 0x278   :  { %318 = vadd.xlane.f32.xlu2 %v1651_v60 }
 0x280   :  { %324 = vadd.xlane.f32.xlu2 %v1653_v18 }
 0x284   :  { %1309 = vrot.lane.b32.xlu0 %v1276_v10, %s1722_s0 }
 0x28a   :  { %1307 = vrot.lane.b32.xlu1 %v1275_v2, %s1722_s0 }
 0x29b   :  { %v2295_v36 = vpop.xlane.xlu0 %903 }
 0x29c   :  { %1662 = vrcp.f32 %v2295_v36  ;;  %v1104_v2 = vand.u32 2147483648, %v2295_v36  ;;  %vm1098_vm5 = vweird.f32 %v2295_v36  ;;  %v1102_v42 = vand.u32 2147483647, %v2295_v36 }
 0x29e   :  { %vm1103_vm7 = vcmp.eq.f32.partialorder %v1102_v42, 8.507059e+37 }
 0x2a2   :  { %v2307_v40 = vpop.eup %1662 }
 0x2a3   :  { %v2305_v1 = vpop.xlane.xlu2 %905  ;;  %v1094_v49 = vmul.f32 %v2307_v40, %v2295_v36  ;;  %vm1099_vm3 = vweird.f32 %v2307_v40 }
 0x2a4   :  { %vm2359_vm6 = vmor %vm1098_vm5, %vm1099_vm3 }
 0x2a5   :  { %v1095_v59 = vsub.f32 1.0, %v1094_v49 }
 0x2a7   :  { %v1016_v25 = vpop.f32.mrf.mxu1  ;;  %v1096_v7 = vmul.f32 %v2307_v40, %v1095_v59 }
 0x2a8   :  { %v1277_v57 = vmul.f32 %v1092_v24, %v1016_v25  ;;  %v1105_v25 = vor.u32 1.1754944e-38, %v1104_v2 }
 0x2a9   :  { %v1097_v17 = vadd.f32 %v2307_v40, %v1096_v7 }
 0x2aa   :  { %1311 = vrot.lane.b32.xlu2 %v1277_v57, %s1722_s0 }
 0x2ab   :  { %v2298_v46 = vpop.xlane.xlu0 %909  ;;  %v1101_v53 = vsel %vm2359_vm6, %v2307_v40, %v1097_v17 }
 0x2ac   :  { %v2300_v21 = vpop.xlane.xlu1 %907 }
 0x2ad   :  { %v1132_v4 = vand.u32 2147483648, %v2300_v21 }
 0x2af   :  { %v1018_v30 = vpop.f32.mrf.mxu1 }
 0x2b3   :  { %v916_v3 = vpop.xlane.xlu0 %915 }
 0x2b4   :  { %1664 = vrcp.f32 %v916_v3  ;;  %v914_v14 = vpop.xlane.xlu1 %913  ;;  %v1188_v18 = vand.u32 2147483648, %v916_v3  ;;  %v1186_v34 = vand.u32 2147483647, %v916_v3  ;;  %vm1182_vm13 = vweird.f32 %v916_v3 }
 0x2b5   :  { %1666 = vrcp.f32 %v914_v14  ;;  %v1174_v37 = vand.u32 2147483648, %v914_v14  ;;  %vm1168_vm0 = vweird.f32 %v914_v14  ;;  %v1172_v12 = vand.u32 2147483647, %v914_v14 }
 0x2b6   :  { %v1189_v16 = vor.u32 1.1754944e-38, %v1188_v18  ;;  %vm1187_vm1 = vcmp.eq.f32.partialorder %v1186_v34, 8.507059e+37 }
 0x2b7   :  { %v1175_v6 = vor.u32 1.1754944e-38, %v1174_v37  ;;  %vm1173_vm4 = vcmp.eq.f32.partialorder %v1172_v12, 8.507059e+37 }
 0x2ba   :  { %v1665_v32 = vpop.eup %1664 }
 0x2bb   :  { %v1667_v8 = vpop.eup %1666  ;;  %v1178_v63 = vmul.f32 %v1665_v32, %v916_v3  ;;  %v2311_v55 = vpop.xlane.xlu2 %911  ;;  %vm1183_vm12 = vweird.f32 %v1665_v32 }
 0x2bc   :  { %v1164_v60 = vmul.f32 %v1667_v8, %v914_v14  ;;  %v2313_v38 = vpop.xlane.xlu1 %919  ;;  %v2316_v22 = vpop.xlane.xlu0 %921  ;;  %vm1169_vm14 = vweird.f32 %v1667_v8  ;;  %vm1184_vm15 = vmor %vm1182_vm13, %vm1183_vm12  ;;  %v1106_v14 = vsel %vm1103_vm7, %v1105_v25, %v1101_v53  ;;  %vm1126_vm13 = vweird.f32 %v2300_v21 }
 0x2bd   :  { %v1179_v43 = vsub.f32 1.0, %v1178_v63  ;;  %1668 = vrcp.f32 %v2313_v38  ;;  %vm2326_vm2 = vmor %vm1168_vm0, %vm1169_vm14  ;;  %vm1210_vm9 = vweird.f32 %v2313_v38  ;;  %v1214_v63 = vand.u32 2147483647, %v2313_v38 }
 0x2be   :  { %v1165_v5 = vsub.f32 1.0, %v1164_v60  ;;  %1670 = vrcp.f32 %v2300_v21  ;;  %v1133_v53 = vor.u32 1.1754944e-38, %v1132_v4 }
 0x2bf   :  { %v1180_v20 = vmul.f32 %v1665_v32, %v1179_v43  ;;  %1672 = vrcp.f32 %v2305_v1  ;;  %vm1215_vm11 = vcmp.eq.f32.partialorder %v1214_v63, 8.507059e+37 }
 0x2c0   :  { %v1166_v48 = vmul.f32 %v1667_v8, %v1165_v5  ;;  %1674 = vrcp.f32 %v2284_v41 }
 0x2c1   :  { %v1181_v47 = vadd.f32 %v1665_v32, %v1180_v20 }
 0x2c2   :  { %v1167_v23 = vadd.f32 %v1667_v8, %v1166_v48 }
 0x2c3   :  { %v1185_v11 = vsel %vm1184_vm15, %v1665_v32, %v1181_v47  ;;  %v2321_v13 = vpop.eup %1668  ;;  %v2324_v19 = vpop.xlane.xlu2 %917  ;;  %v1278_v32 = vmul.f32 %v1106_v14, %v1018_v30 }
 0x2c4   :  { %v1206_v50 = vmul.f32 %v2321_v13, %v2313_v38  ;;  %v1190_v29 = vsel %vm1187_vm1, %v1189_v16, %v1185_v11  ;;  %v1171_v61 = vsel %vm2326_vm2, %v1667_v8, %v1167_v23  ;;  %v2334_v15 = vpop.eup %1670  ;;  %v2337_v26 = vpop.xlane.xlu1 %925  ;;  %1676 = vrcp.f32 %v2324_v19 }
 0x2c5   :  { %v1284_v10 = vmul.f32 %v1190_v29, %v1033_v62  ;;  %v1176_v56 = vsel %vm1173_vm4, %v1175_v6, %v1171_v61  ;;  %v1122_v39 = vmul.f32 %v2334_v15, %v2300_v21  ;;  %v2346_v44 = vpop.xlane.xlu0 %927  ;;  %1678 = vrcp.f32 %v2337_v26  ;;  %v2365_v45 = vpop.eup %1672 }
 0x2c6   :  { %v1207_v52 = vsub.f32 1.0, %v1206_v50  ;;  %v1283_v54 = vmul.f32 %v1176_v56, %v2302_v27  ;;  %1680 = vrcp.f32 %v2298_v46  ;;  %v2373_v0 = vpop.eup %1674  ;;  %vm1211_vm8 = vweird.f32 %v2321_v13  ;;  %v2386_v8 = vpop.f32.mrf.mxu1 }
 0x2c7   :  { %1325 = vrot.lane.b32.xlu0 %v1284_v10, %s1722_s0  ;;  %1682 = vrcp.f32 %v2316_v22  ;;  %v1123_v58 = vsub.f32 1.0, %v1122_v39  ;;  %v1108_v3 = vmul.f32 %v2365_v45, %v2305_v1  ;;  %v1216_v62 = vand.u32 2147483648, %v2313_v38  ;;  %vm2393_vm10 = vmor %vm1210_vm9, %vm1211_vm8  ;;  %v2415_v23 = vpop.f32.mrf.mxu3 }
 0x2c8   :  { %v1208_v33 = vmul.f32 %v2321_v13, %v1207_v52  ;;  %1323 = vrot.lane.b32.xlu2 %v1283_v54, %s1722_s0  ;;  %1684 = vrcp.f32 %v2279_v31  ;;  %v2413_v37 = vmul.f32 %v2373_v0, %v2284_v41  ;;  %vm1127_vm12 = vweird.f32 %v2334_v15 }
 0x2c9   :  { %v1124_v60 = vmul.f32 %v2334_v15, %v1123_v58  ;;  %v1109_v59 = vsub.f32 1.0, %v1108_v3  ;;  %v1217_v34 = vor.u32 1.1754944e-38, %v1216_v62  ;;  %1686 = vrcp.f32 %v2346_v44  ;;  %vm2436_vm14 = vmor %vm1126_vm13, %vm1127_vm12 }
 0x2ca   :  { %v2375_v24 = vpop.eup %1676  ;;  %v1209_v57 = vadd.f32 %v2321_v13, %v1208_v33  ;;  %1688 = vrcp.f32 %v2311_v55  ;;  %v1130_v52 = vand.u32 2147483647, %v2300_v21  ;;  %v449_v17 = vsub.f32 1.0, %v2413_v37 }
 0x2cb   :  { %v2371_v36 = vpop.xlane.xlu2 %923  ;;  %v2379_v27 = vpop.eup %1678  ;;  %v1192_v20 = vmul.f32 %v2375_v24, %v2324_v19  ;;  %v1110_v6 = vmul.f32 %v2365_v45, %v1109_v59  ;;  %1690 = vrcp.f32 %v2291_v51  ;;  %v1230_v54 = vand.u32 2147483648, %v2316_v22 }
 0x2cc   :  { %v2384_v40 = vpop.eup %1680  ;;  %v1248_v18 = vmul.f32 %v2379_v27, %v2337_v26  ;;  %v1213_v38 = vsel %vm2393_vm10, %v2321_v13, %v1209_v57  ;;  %v1125_v13 = vadd.f32 %v2334_v15, %v1124_v60  ;;  %v2430_v61 = vpop.xlane.xlu1 %302  ;;  %v1118_v33 = vand.u32 2147483648, %v2305_v1 }
 0x2cd   :  { %v2390_v49 = vpop.eup %1682  ;;  %v1136_v48 = vmul.f32 %v2384_v40, %v2298_v46  ;;  %v2409_v47 = vpop.xlane.xlu0 %304  ;;  %v1218_v7 = vsel %vm1215_vm11, %v1217_v34, %v1213_v38  ;;  %v1193_v50 = vsub.f32 1.0, %v1192_v20  ;;  %v2454_v25 = vadd.f32 %v2365_v45, %v1110_v6 }
 0x2ce   :  { %v2397_v5 = vpop.eup %1684  ;;  %v1220_v16 = vmul.f32 %v2390_v49, %v2316_v22  ;;  %v1249_v29 = vsub.f32 1.0, %v1248_v18  ;;  %v1286_v39 = vmul.f32 %v1218_v7, %v2350_v35  ;;  %v1129_v42 = vsel %vm2436_vm14, %v2334_v15, %v1125_v13  ;;  %v1023_v28 = vpop.f32.mrf.mxu1 }
 0x2cf   :  { %1313 = vrot.lane.b32.xlu0 %v1278_v32, %s1722_s0  ;;  %v2424_v12 = vmul.f32 %v2397_v5, %v2279_v31  ;;  %v1137_v30 = vsub.f32 1.0, %v1136_v48  ;;  %v2447_v21 = vpop.eup %1686  ;;  %v1194_v58 = vmul.f32 %v2375_v24, %v1193_v50  ;;  %vm1113_vm15 = vweird.f32 %v2365_v45  ;;  %v2470_v20 = vpop.f32.mrf.mxu3 }
 0x2d0   :  { %v1221_v10 = vsub.f32 1.0, %v1220_v16  ;;  %v1250_v35 = vmul.f32 %v2379_v27, %v1249_v29  ;;  %1329 = vrot.lane.b32.xlu2 %v1286_v39, %s1722_s0  ;;  %vm1131_vm0 = vcmp.eq.f32.partialorder %v1130_v52, 8.507059e+37  ;;  %vm1224_vm1 = vweird.f32 %v2316_v22  ;;  %v2462_v14 = vpop.eup %1688 }
 0x2d1   :  { %v463_v2 = vsub.f32 1.0, %v2424_v12  ;;  %v1138_v15 = vmul.f32 %v2384_v40, %v1137_v30  ;;  %v1134_v3 = vsel %vm1131_vm0, %v1133_v53, %v1129_v42  ;;  %vm1253_vm2 = vweird.f32 %v2379_v27  ;;  %v2478_v34 = vpop.eup %1690 }
 0x2d2   :  { %v1222_v57 = vmul.f32 %v2390_v49, %v1221_v10  ;;  %vm1141_vm3 = vweird.f32 %v2384_v40  ;;  %vm1112_vm4 = vweird.f32 %v2305_v1  ;;  %v1231_v62 = vor.u32 1.1754944e-38, %v1230_v54 }
 0x2d3   :  { %v2420_v11 = vpop.xlane.xlu2 %300  ;;  %v1280_v32 = vmul.f32 %v1134_v3, %v1023_v28  ;;  %v1262_v63 = vmul.f32 %v2447_v21, %v2346_v44  ;;  %v1202_v60 = vand.u32 2147483648, %v2324_v19  ;;  %v1251_v18 = vadd.f32 %v2379_v27, %v1250_v35  ;;  %vm2522_vm0 = vmor %vm1112_vm4, %vm1113_vm15 }
 0x2d4   :  { %vm1252_vm5 = vweird.f32 %v2337_v26  ;;  %v1195_v38 = vadd.f32 %v2375_v24, %v1194_v58  ;;  %v1228_v59 = vand.u32 2147483647, %v2316_v22  ;;  %vm1196_vm6 = vweird.f32 %v2324_v19  ;;  %v2493_v29 = vpop.xlane.xlu1 %308 }
 0x2d5   :  { %v2468_v43 = vpop.xlane.xlu0 %310  ;;  %vm2483_vm7 = vmor %vm1252_vm5, %vm1253_vm2  ;;  %v1258_v13 = vand.u32 2147483648, %v2337_v26  ;;  %vm1197_vm8 = vweird.f32 %v2375_v24  ;;  %v1200_v7 = vand.u32 2147483647, %v2324_v19  ;;  %v1150_v4 = vmul.f32 %v2462_v14, %v2311_v55 }
 0x2d6   :  { %v1256_v50 = vand.u32 2147483647, %v2337_v26  ;;  %vm2495_vm9 = vmor %vm1196_vm6, %vm1197_vm8  ;;  %v1223_v6 = vadd.f32 %v2390_v49, %v1222_v57  ;;  %vm1225_vm10 = vweird.f32 %v2390_v49  ;;  %v1263_v52 = vsub.f32 1.0, %v1262_v63 }
 0x2d7   :  { %v1203_v10 = vor.u32 1.1754944e-38, %v1202_v60  ;;  %1692 = vrcp.f32 %v2371_v36  ;;  %v1199_v19 = vsel %vm2495_vm9, %v2375_v24, %v1195_v38  ;;  %vm1226_vm11 = vmor %vm1224_vm1, %vm1225_vm10  ;;  %v1255_v26 = vsel %vm2483_vm7, %v2379_v27, %v1251_v18  ;;  %v1046_v57 = vpop.f32.mrf.mxu3 }
 0x2d8   :  { %vm1201_vm12 = vcmp.eq.f32.partialorder %v1200_v7, 8.507059e+37  ;;  %v1227_v56 = vsel %vm1226_vm11, %v2390_v49, %v1223_v6  ;;  %vm1229_vm13 = vcmp.eq.f32.partialorder %v1228_v59, 8.507059e+37  ;;  %1317 = vrot.lane.b32.xlu2 %v1280_v32, %s1722_s0  ;;  %v1259_v39 = vor.u32 1.1754944e-38, %v1258_v13  ;;  %v1026_v32 = vpop.f32.mrf.mxu1 }
 0x2d9   :  { %v1139_v54 = vadd.f32 %v2384_v40, %v1138_v15  ;;  %v1204_v42 = vsel %vm1201_vm12, %v1203_v10, %v1199_v19  ;;  %v1232_v28 = vsel %vm1229_vm13, %v1231_v62, %v1227_v56  ;;  %v1151_v53 = vsub.f32 1.0, %v1150_v4  ;;  %v407_v10 = vpop.f32.mrf.mxu0 }
 0x2da   :  { %vm1257_vm14 = vcmp.eq.f32.partialorder %v1256_v50, 8.507059e+37  ;;  %v1285_v22 = vmul.f32 %v1204_v42, %v2318_v9  ;;  %v1287_v24 = vmul.f32 %v1232_v28, %v2415_v23  ;;  %v1116_v58 = vand.u32 2147483647, %v2305_v1 }
 0x2db   :  { %v2476_v48 = vpop.xlane.xlu2 %306  ;;  %v1260_v27 = vsel %vm1257_vm14, %v1259_v39, %v1255_v26  ;;  %v1144_v35 = vand.u32 2147483647, %v2298_v46  ;;  %v1146_v49 = vand.u32 2147483648, %v2298_v46  ;;  %vm1140_vm1 = vweird.f32 %v2298_v46 }
 0x2dc   :  { %v1264_v9 = vmul.f32 %v2447_v21, %v1263_v52  ;;  %1327 = vrot.lane.b32.xlu1 %v1285_v22, %s1722_s0  ;;  %1331 = vrot.lane.b32.xlu0 %v1287_v24, %s1722_s0  ;;  %v450_v3 = vmul.f32 %v2373_v0, %v449_v17  ;;  %v1115_v62 = vsel %vm2522_vm0, %v2365_v45, %v2454_v25  ;;  %vm2541_vm15 = vmor %vm1140_vm1, %vm1141_vm3  ;;  %v1119_v60 = vor.u32 1.1754944e-38, %v1118_v33 }
 0x2dd   :  { %v2530_v23 = vpop.eup %1692  ;;  %v2545_v63 = vpop.xlane.xlu0 %316  ;;  %v1289_v37 = vmul.f32 %v1260_v27, %v1046_v57  ;;  %v1143_v17 = vsel %vm2541_vm15, %v2384_v40, %v1139_v54  ;;  %v1152_v18 = vmul.f32 %v2462_v14, %v1151_v53  ;;  %vm452_vm2 = vweird.f32 %v2284_v41 }
 0x2de   :  { %v464_v25 = vmul.f32 %v2397_v5, %v463_v2  ;;  %vm1117_vm3 = vcmp.eq.f32.partialorder %v1116_v58, 8.507059e+37  ;;  %vm1145_vm4 = vcmp.eq.f32.partialorder %v1144_v35, 8.507059e+37  ;;  %v1147_v38 = vor.u32 1.1754944e-38, %v1146_v49  ;;  %v2563_v40 = vpop.xlane.xlu1 %314 }
 0x2df   :  { %v1120_v1 = vsel %vm1117_vm3, %v1119_v60, %v1115_v62  ;;  %v1234_v33 = vmul.f32 %v2530_v23, %v2371_v36  ;;  %v1265_v59 = vadd.f32 %v2447_v21, %v1264_v9  ;;  %vm1267_vm5 = vweird.f32 %v2447_v21  ;;  %v1048_v9 = vpop.f32.mrf.mxu3 }
 0x2e0   :  { %1335 = vrot.lane.b32.xlu2 %v1289_v37, %s1722_s0  ;;  %v1279_v16 = vmul.f32 %v1120_v1, %v2386_v8  ;;  %v1148_v12 = vsel %vm1145_vm4, %v1147_v38, %v1143_v17  ;;  %vm1266_vm6 = vweird.f32 %v2346_v44  ;;  %v1272_v2 = vand.u32 2147483648, %v2346_v44  ;;  %v1028_v24 = vpop.f32.mrf.mxu1 }
 0x2e1   :  { %v1281_v13 = vmul.f32 %v1148_v12, %v1026_v32  ;;  %v1270_v7 = vand.u32 2147483647, %v2346_v44  ;;  %v1153_v4 = vadd.f32 %v2462_v14, %v1152_v18  ;;  %vm1155_vm7 = vweird.f32 %v2462_v14  ;;  %vm2576_vm8 = vmor %vm1266_vm6, %vm1267_vm5 }
 0x2e2   :  { %v456_v50 = vand.u32 2147483647, %v2284_v41  ;;  %v458_v30 = vand.u32 2147483648, %v2284_v41  ;;  %v476_v6 = vmul.f32 %v2478_v34, %v2291_v51  ;;  %v1160_v52 = vand.u32 2147483648, %v2311_v55 }
 0x2e3   :  { %v2553_v45 = vpop.xlane.xlu2 %312  ;;  %v1235_v19 = vsub.f32 1.0, %v1234_v33  ;;  %v1269_v44 = vsel %vm2576_vm8, %v2447_v21, %v1265_v59  ;;  %vm1154_vm9 = vweird.f32 %v2311_v55  ;;  %v1158_v26 = vand.u32 2147483647, %v2311_v55  ;;  %v409_v33 = vpop.f32.mrf.mxu0 }
 0x2e4   :  { %1315 = vrot.lane.b32.xlu1 %v1279_v16, %s1722_s0  ;;  %1319 = vrot.lane.b32.xlu0 %v1281_v13, %s1722_s0  ;;  %v451_v56 = vadd.f32 %v2373_v0, %v450_v3  ;;  %vm453_vm10 = vweird.f32 %v2373_v0  ;;  %v470_v39 = vand.u32 2147483647, %v2279_v31  ;;  %v1273_v54 = vor.u32 1.1754944e-38, %v1272_v2  ;;  %vm2593_vm11 = vmor %vm1154_vm9, %vm1155_vm7 }
 0x2e5   :  { %v465_v21 = vadd.f32 %v2397_v5, %v464_v25  ;;  %vm467_vm12 = vweird.f32 %v2397_v5  ;;  %vm1271_vm13 = vcmp.eq.f32.partialorder %v1270_v7, 8.507059e+37  ;;  %v1157_v55 = vsel %vm2593_vm11, %v2462_v14, %v1153_v4  ;;  %v2603_v27 = vpop.xlane.xlu0 %322  ;;  %vm2607_vm14 = vmor %vm452_vm2, %vm453_vm10 }
 0x2e6   :  { %v472_v28 = vand.u32 2147483648, %v2279_v31  ;;  %v477_v53 = vsub.f32 1.0, %v476_v6  ;;  %v1274_v22 = vsel %vm1271_vm13, %v1273_v54, %v1269_v44  ;;  %v1161_v58 = vor.u32 1.1754944e-38, %v1160_v52  ;;  %v2626_v32 = vpop.xlane.xlu1 %320 }
 0x2e7   :  { %vm466_vm0 = vweird.f32 %v2279_v31  ;;  %v1236_v49 = vmul.f32 %v2530_v23, %v1235_v19  ;;  %vm1159_vm1 = vcmp.eq.f32.partialorder %v1158_v26, 8.507059e+37  ;;  %vm2615_vm15 = vcmp.eq.f32.partialorder %v456_v50, 8.507059e+37 }
 0x2e8   :  { %vm2621_vm3 = vmor %vm466_vm0, %vm467_vm12  ;;  %v1244_v41 = vand.u32 2147483648, %v2371_v36  ;;  %v1162_v3 = vsel %vm1159_vm1, %v1161_v58, %v1157_v55  ;;  %v1290_v31 = vmul.f32 %v1274_v22, %v1048_v9  ;;  %v455_v60 = vsel %vm2607_vm14, %v2373_v0, %v451_v56 }
 0x2e9   :  { %v1282_v62 = vmul.f32 %v1162_v3, %v1028_v24  ;;  %v469_v46 = vsel %vm2621_vm3, %v2397_v5, %v465_v21  ;;  %v459_v37 = vor.u32 1.1754944e-38, %v458_v30  ;;  %vm471_vm2 = vcmp.eq.f32.partialorder %v470_v39, 8.507059e+37 }
 0x2ea   :  { %v473_v17 = vor.u32 1.1754944e-38, %v472_v28  ;;  %v478_v18 = vmul.f32 %v2478_v34, %v477_v53  ;;  %vm1238_vm4 = vweird.f32 %v2371_v36  ;;  %v1237_v25 = vadd.f32 %v2530_v23, %v1236_v49  ;;  %v427_v53 = vpop.f32.mrf.mxu2 }
 0x2eb   :  { %v2613_v14 = vpop.xlane.xlu2 %318  ;;  %vm1239_vm5 = vweird.f32 %v2530_v23  ;;  %v1242_v5 = vand.u32 2147483647, %v2371_v36  ;;  %v1245_v38 = vor.u32 1.1754944e-38, %v1244_v41  ;;  %v460_v1 = vsel %vm2615_vm15, %v459_v37, %v455_v60  ;;  %v2650_v36 = vld [vmem:[%s2981_s4] ss:$0 sm:$0xff] }
 0x2ec   :  { %1337 = vrot.lane.b32.xlu0 %v1290_v31, %s1722_s0  ;;  %1321 = vrot.lane.b32.xlu1 %v1282_v62, %s1722_s0  ;;  %vm1240_vm6 = vmor %vm1238_vm4, %vm1239_vm5  ;;  %v474_v0 = vsel %vm471_vm2, %v473_v17, %v469_v46  ;;  %v479_v16 = vadd.f32 %v2478_v34, %v478_v18  ;;  %vm481_vm8 = vweird.f32 %v2478_v34  ;;  %v486_v13 = vand.u32 2147483648, %v2291_v51 }
 0x2ed   :  { %v1241_v59 = vsel %vm1240_vm6, %v2530_v23, %v1237_v25  ;;  %vm1243_vm7 = vcmp.eq.f32.partialorder %v1242_v5, 8.507059e+37  ;;  %v672_v7 = vmul.f32 %v474_v0, %v409_v33  ;;  %v671_v4 = vmul.f32 %v460_v1, %v407_v10 }
 0x2ee   :  { %v1246_v12 = vsel %vm1243_vm7, %v1245_v38, %v1241_v59  ;;  %vm480_vm9 = vweird.f32 %v2291_v51  ;;  %v484_v23 = vand.u32 2147483647, %v2291_v51  ;;  %vm1355_vm10 = vcmask 261120  }
 0x2ef   :  { %vm1372_vm11 = vcmask 523264   ;;  %vm2654_vm12 = vmor %vm480_vm9, %vm481_vm8  ;;  %v1288_v30 = vmul.f32 %v1246_v12, %v2470_v20  ;;  %v487_v44 = vor.u32 1.1754944e-38, %v486_v13  ;;  %1694 = vrcp.f32 %v2468_v43 }
 0x2f0   :  { %v483_v51 = vsel %vm2654_vm12, %v2478_v34, %v479_v16  ;;  %vm485_vm13 = vcmp.eq.f32.partialorder %v484_v23, 8.507059e+37  ;;  %v412_v34 = vpop.f32.mrf.mxu0  ;;  %1696 = vrcp.f32 %v2545_v63  ;;  %v570_v9 = vand.u32 2147483648, %v2468_v43 }
 0x2f1   :  { %v488_v39 = vsel %vm485_vm13, %v487_v44, %v483_v51  ;;  %1698 = vrcp.f32 %v2409_v47  ;;  %vm564_vm0 = vweird.f32 %v2468_v43  ;;  %v568_v3 = vand.u32 2147483647, %v2468_v43 }
 0x2f2   :  { %v673_v54 = vmul.f32 %v488_v39, %v412_v34  ;;  %v2685_v58 = vpop.f32.mrf.mxu2  ;;  %1700 = vrcp.f32 %v2553_v45  ;;  %v571_v46 = vor.u32 1.1754944e-38, %v570_v9  ;;  %v612_v50 = vand.u32 2147483648, %v2545_v63 }
 0x2f3   :  { %v2659_v6 = vpop.xlane.xlu2 %324  ;;  %vm569_vm15 = vcmp.eq.f32.partialorder %v568_v3, 8.507059e+37  ;;  %1702 = vrcp.f32 %v2420_v11  ;;  %vm606_vm2 = vweird.f32 %v2545_v63  ;;  %vm522_vm8 = vweird.f32 %v2409_v47 }
 0x2f4   :  { %1333 = vrot.lane.b32.xlu1 %v1288_v30, %s1722_s0  ;;  %1704 = vrcp.f32 %v2603_v27  ;;  %v610_v30 = vand.u32 2147483647, %v2545_v63  ;;  %vm578_vm12 = vweird.f32 %v2553_v45 }
 0x2f5   :  { %v1695_v22 = vpop.eup %1694  ;;  %1706 = vrcp.f32 %v2563_v40 }
 0x2f6   :  { %v1310_v2 = vpop.permute.xlu0 %1309  ;;  %v560_v24 = vmul.f32 %v1695_v22, %v2468_v43  ;;  %v1697_v15 = vpop.eup %1696  ;;  %vm565_vm14 = vweird.f32 %v1695_v22  ;;  %vm611_vm5 = vcmp.eq.f32.partialorder %v610_v30, 8.507059e+37  ;;  %1708 = vrcp.f32 %v2613_v14 }
 0x2f7   :  { %v1357_v8 = vsel %vm1355_vm10, %v672_v7, %v1310_v2  ;;  %vm566_vm1 = vmor %vm564_vm0, %vm565_vm14  ;;  %v602_v31 = vmul.f32 %v1697_v15, %v2545_v63  ;;  %v2696_v60 = vpop.eup %1698  ;;  %vm607_vm3 = vweird.f32 %v1697_v15  ;;  %1710 = vrcp.f32 %v2430_v61 }
 0x2f8   :  { %v1374_v19 = vsel %vm1372_vm11, %v1357_v8, 0.0  ;;  %v561_v35 = vsub.f32 1.0, %v560_v24  ;;  %v2698_v18 = vpop.eup %1700  ;;  %v518_v5 = vmul.f32 %v2696_v60, %v2409_v47  ;;  %v2706_v33 = vpop.f32.mrf.mxu0  ;;  %vm608_vm4 = vmor %vm606_vm2, %vm607_vm3  ;;  %vm523_vm6 = vweird.f32 %v2696_v60 }
 0x2f9   :  { %v1394_v26 = vadd.f32 %v2650_v36, %v1374_v19  ;;  %v603_v37 = vsub.f32 1.0, %v602_v31  ;;  %v574_v0 = vmul.f32 %v2698_v18, %v2553_v45  ;;  %v2711_v2 = vpop.eup %1702  ;;  %vm579_vm7 = vweird.f32 %v2698_v18  ;;  %vm2738_vm9 = vmor %vm522_vm8, %vm523_vm6 }
 0x2fa   :  { %v562_v49 = vmul.f32 %v1695_v22, %v561_v35  ;;  %v2688_v57 = vpop.f32.mrf.mxu2  ;;  %v519_v13 = vsub.f32 1.0, %v518_v5  ;;  %v2713_v23 = vpop.eup %1704  ;;  %v490_v8 = vmul.f32 %v2711_v2, %v2420_v11  ;;  %vm2746_vm13 = vmor %vm578_vm12, %vm579_vm7  ;;  %vm494_vm3 = vweird.f32 %v2420_v11 }
 0x2fb   :  { %1410 = vst [vmem:[%s2982_s5 + $0x8] sm:$0xff] %v1394_v26  ;;  %v604_v38 = vmul.f32 %v1697_v15, %v603_v37  ;;  %v644_v19 = vmul.f32 %v2713_v23, %v2603_v27  ;;  %v613_v26 = vor.u32 1.1754944e-38, %v612_v50  ;;  %v500_v5 = vand.u32 2147483648, %v2420_v11 }
 0x2fc   :  { %v1308_v52 = vpop.permute.xlu1 %1307  ;;  %v563_v41 = vadd.f32 %v1695_v22, %v562_v49  ;;  %v491_v63 = vsub.f32 1.0, %v490_v8  ;;  %1712 = vrcp.f32 %v2476_v48  ;;  %vm592_vm12 = vweird.f32 %v2563_v40 }
 0x2fd   :  { %v1356_v10 = vsel %vm1355_vm10, %v671_v4, %v1308_v52  ;;  %v605_v7 = vadd.f32 %v1697_v15, %v604_v38  ;;  %v575_v4 = vsub.f32 1.0, %v574_v0  ;;  %v520_v52 = vmul.f32 %v2696_v60, %v519_v13 }
 0x2fe   :  { %v1373_v20 = vsel %vm1372_vm11, %v1356_v10, 0.0  ;;  %v567_v62 = vsel %vm566_vm1, %v1695_v22, %v563_v41  ;;  %v645_v34 = vsub.f32 1.0, %v644_v19  ;;  %v492_v24 = vmul.f32 %v2711_v2, %v491_v63 }
 0x2ff   :  { %v1393_v56 = vadd.f32 %v2650_v36, %v1373_v20  ;;  %v572_v17 = vsel %vm569_vm15, %v571_v46, %v567_v62  ;;  %v576_v10 = vmul.f32 %v2698_v18, %v575_v4  ;;  %v609_v51 = vsel %vm608_vm4, %v1697_v15, %v605_v7  ;;  %v2787_v7 = vpop.eup %1706 }
 0x300   :  { %v679_v43 = vmul.f32 %v572_v17, %v427_v53  ;;  %v2729_v20 = vpop.f32.mrf.mxu0  ;;  %v521_v39 = vadd.f32 %v2696_v60, %v520_v52  ;;  %v582_v53 = vand.u32 2147483647, %v2553_v45  ;;  %v646_v15 = vmul.f32 %v2713_v23, %v645_v34  ;;  %v2797_v30 = vpop.eup %1708 }
 0x301   :  { %1409 = vst [vmem:[%s2982_s5] sm:$0xff] %v1393_v56  ;;  %v614_v56 = vsel %vm611_vm5, %v613_v26, %v609_v51  ;;  %vm495_vm1 = vweird.f32 %v2711_v2  ;;  %v493_v17 = vadd.f32 %v2711_v2, %v492_v24  ;;  %vm649_vm15 = vweird.f32 %v2713_v23 }
 0x302   :  { %v434_v25 = vpop.f32.mrf.mxu2  ;;  %vm583_vm0 = vcmp.eq.f32.partialorder %v582_v53, 8.507059e+37  ;;  %v654_v38 = vand.u32 2147483648, %v2603_v27  ;;  %vm2775_vm2 = vmor %vm494_vm3, %vm495_vm1  ;;  %vm648_vm4 = vweird.f32 %v2603_v27  ;;  %v501_v8 = vor.u32 1.1754944e-38, %v500_v5 }
 0x303   :  { %v682_v22 = vmul.f32 %v614_v56, %v434_v25  ;;  %vm2783_vm5 = vmor %vm648_vm4, %vm649_vm15  ;;  %v616_v56 = vmul.f32 %v2797_v30, %v2613_v14  ;;  %1714 = vrcp.f32 %v2493_v29  ;;  %vm593_vm8 = vweird.f32 %v2787_v7 }
 0x304   :  { %v1312_v42 = vpop.permute.xlu2 %1311  ;;  %v655_v52 = vor.u32 1.1754944e-38, %v654_v38  ;;  %1716 = vrcp.f32 %v2659_v6  ;;  %v596_v38 = vand.u32 2147483647, %v2563_v40  ;;  %v624_v0 = vand.u32 2147483647, %v2613_v14 }
 0x305   :  { %v1358_v21 = vsel %vm1355_vm10, %v673_v54, %v1312_v42  ;;  %v577_v54 = vadd.f32 %v2698_v18, %v576_v10  ;;  %v528_v42 = vand.u32 2147483648, %v2409_v47  ;;  %v617_v53 = vsub.f32 1.0, %v616_v56 }
 0x306   :  { %v1375_v55 = vsel %vm1372_vm11, %v1358_v21, 0.0  ;;  %v584_v21 = vand.u32 2147483648, %v2553_v45  ;;  %1718 = vrcp.f32 %v2626_v32  ;;  %vm597_vm15 = vcmp.eq.f32.partialorder %v596_v38, 8.507059e+37 }
 0x307   :  { %v1395_v28 = vadd.f32 %v2650_v36, %v1375_v55  ;;  %v581_v45 = vsel %vm2746_vm13, %v2698_v18, %v577_v54  ;;  %v529_v9 = vor.u32 1.1754944e-38, %v528_v42  ;;  %v647_v18 = vadd.f32 %v2713_v23, %v646_v15  ;;  %vm2850_vm13 = vmor %vm592_vm12, %vm593_vm8 }
 0x308   :  { %v585_v3 = vor.u32 1.1754944e-38, %v584_v21  ;;  %v419_v25 = vpop.f32.mrf.mxu0  ;;  %vm625_vm3 = vcmp.eq.f32.partialorder %v624_v0, 8.507059e+37  ;;  %vm508_vm4 = vweird.f32 %v2430_v61 }
 0x309   :  { %1411 = vst [vmem:[%s2982_s5 + $0x10] sm:$0xff] %v1395_v28  ;;  %v526_v28 = vand.u32 2147483647, %v2409_v47  ;;  %v525_v47 = vsel %vm2738_vm9, %v2696_v60, %v521_v39  ;;  %v651_v4 = vsel %vm2783_vm5, %v2713_v23, %v647_v18  ;;  %v2811_v39 = vpop.eup %1710  ;;  %vm621_vm9 = vweird.f32 %v2797_v30 }
 0x30a   :  { %v2727_v44 = vpop.f32.mrf.mxu2  ;;  %v586_v37 = vsel %vm583_vm0, %v585_v3, %v581_v45  ;;  %v2819_v35 = vpop.eup %1712  ;;  %v618_v3 = vmul.f32 %v2797_v30, %v617_v53  ;;  %vm509_vm1 = vweird.f32 %v2811_v39 }
 0x30b   :  { %vm527_vm14 = vcmp.eq.f32.partialorder %v526_v28, 8.507059e+37  ;;  %v532_v45 = vmul.f32 %v2819_v35, %v2476_v48  ;;  %vm2880_vm5 = vmor %vm508_vm4, %vm509_vm1  ;;  %vm662_vm1 = vweird.f32 %v2659_v6 }
 0x30c   :  { %v530_v60 = vsel %vm527_vm14, %v529_v9, %v525_v47  ;;  %v504_v47 = vmul.f32 %v2811_v39, %v2430_v61  ;;  %v619_v18 = vadd.f32 %v2797_v30, %v618_v3  ;;  %vm620_vm14 = vweird.f32 %v2613_v14 }
 0x30d   :  { %vm622_vm0 = vmor %vm620_vm14, %vm621_vm9  ;;  %vm550_vm14 = vweird.f32 %v2493_v29  ;;  %v668_v3 = vand.u32 2147483648, %v2659_v6 }
 0x312   :  { %v2762_v46 = vpop.f32.mrf.mxu2 }
 0x31a   :  { %v442_v34 = vpop.f32.mrf.mxu2 }
 0x322   :  { %v1324_v1 = vpop.permute.xlu2 %1323 }
 0x323   :  { %v1364_v59 = vsel %vm1355_vm10, %v679_v43, %v1324_v1  ;;  %v498_v43 = vand.u32 2147483647, %v2420_v11  ;;  %v652_v1 = vand.u32 2147483647, %v2603_v27 }
 0x324   :  { %v1381_v16 = vsel %vm1372_vm11, %v1364_v59, 0.0  ;;  %v676_v59 = vmul.f32 %v530_v60, %v419_v25  ;;  %v598_v25 = vand.u32 2147483648, %v2563_v40 }
 0x325   :  { %v1401_v12 = vadd.f32 %v2650_v36, %v1381_v16  ;;  %v680_v16 = vmul.f32 %v586_v37, %v2685_v58  ;;  %v497_v58 = vsel %vm2775_vm2, %v2711_v2, %v493_v17  ;;  %vm499_vm6 = vcmp.eq.f32.partialorder %v498_v43, 8.507059e+37 }
 0x326   :  { %vm653_vm7 = vcmp.eq.f32.partialorder %v652_v1, 8.507059e+37  ;;  %v502_v63 = vsel %vm499_vm6, %v501_v8, %v497_v58  ;;  %v588_v2 = vmul.f32 %v2787_v7, %v2563_v40  ;;  %v533_v37 = vsub.f32 1.0, %v532_v45 }
 0x327   :  { %1417 = vst [vmem:[%s2982_s5 + $0x40] sm:$0xff] %v1401_v12  ;;  %v656_v26 = vsel %vm653_vm7, %v655_v52, %v651_v4  ;;  %v674_v42 = vmul.f32 %v502_v63, %v2706_v33  ;;  %v626_v43 = vand.u32 2147483648, %v2613_v14  ;;  %vm537_vm2 = vweird.f32 %v2819_v35 }
 0x328   :  { %v685_v54 = vmul.f32 %v656_v26, %v442_v34  ;;  %v589_v28 = vsub.f32 1.0, %v588_v2  ;;  %v534_v12 = vmul.f32 %v2819_v35, %v533_v37  ;;  %vm536_vm6 = vweird.f32 %v2476_v48 }
 0x329   :  { %v627_v4 = vor.u32 1.1754944e-38, %v626_v43  ;;  %vm2889_vm7 = vmor %vm536_vm6, %vm537_vm2  ;;  %v554_v45 = vand.u32 2147483647, %v2493_v29  ;;  %v666_v37 = vand.u32 2147483647, %v2659_v6 }
 0x32a   :  { %v1330_v49 = vpop.permute.xlu2 %1329  ;;  %v590_v9 = vmul.f32 %v2787_v7, %v589_v28 }
 0x32b   :  { %v1367_v41 = vsel %vm1355_vm10, %v682_v22, %v1330_v49  ;;  %vm667_vm2 = vcmp.eq.f32.partialorder %v666_v37, 8.507059e+37 }
 0x32c   :  { %v1384_v31 = vsel %vm1372_vm11, %v1367_v41, 0.0  ;;  %v591_v17 = vadd.f32 %v2787_v7, %v590_v9  ;;  %v556_v9 = vand.u32 2147483648, %v2493_v29 }
 0x32d   :  { %v1404_v62 = vadd.f32 %v2650_v36, %v1384_v31  ;;  %v2839_v31 = vpop.eup %1714 }
 0x32e   :  { %v2842_v60 = vpop.eup %1716  ;;  %v546_v1 = vmul.f32 %v2839_v31, %v2493_v29  ;;  %v595_v40 = vsel %vm2850_vm13, %v2787_v7, %v591_v17  ;;  %v512_v7 = vand.u32 2147483647, %v2430_v61  ;;  %vm551_vm12 = vweird.f32 %v2839_v31 }
 0x32f   :  { %1420 = vst [vmem:[%s2982_s5 + $0x58] sm:$0xff] %v1404_v62  ;;  %v505_v62 = vsub.f32 1.0, %v504_v47  ;;  %v2869_v8 = vpop.eup %1718  ;;  %vm663_vm13 = vweird.f32 %v2842_v60 }
 0x330   :  { %v547_v14 = vsub.f32 1.0, %v546_v1  ;;  %v630_v56 = vmul.f32 %v2869_v8, %v2626_v32  ;;  %vm513_vm8 = vcmp.eq.f32.partialorder %v512_v7, 8.507059e+37  ;;  %vm635_vm4 = vweird.f32 %v2869_v8 }
 0x332   :  { %v1318_v11 = vpop.permute.xlu2 %1317  ;;  %v548_v2 = vmul.f32 %v2839_v31, %v547_v14  ;;  %v640_v14 = vand.u32 2147483648, %v2626_v32 }
 0x333   :  { %v1361_v50 = vsel %vm1355_vm10, %v676_v59, %v1318_v11  ;;  %v658_v59 = vmul.f32 %v2842_v60, %v2659_v6  ;;  %v623_v11 = vsel %vm622_vm0, %v2797_v30, %v619_v18  ;;  %v514_v30 = vand.u32 2147483648, %v2430_v61  ;;  %vm2922_vm0 = vmor %vm550_vm14, %vm551_vm12 }
 0x334   :  { %v1378_v19 = vsel %vm1372_vm11, %v1361_v50, 0.0  ;;  %v628_v58 = vsel %vm625_vm3, %v627_v4, %v623_v11  ;;  %vm555_vm3 = vcmp.eq.f32.partialorder %v554_v45, 8.507059e+37 }
 0x335   :  { %v1398_v23 = vadd.f32 %v2650_v36, %v1378_v19  ;;  %v659_v50 = vsub.f32 1.0, %v658_v59  ;;  %v535_v19 = vadd.f32 %v2819_v35, %v534_v12  ;;  %v683_v63 = vmul.f32 %v628_v58, %v2727_v44 }
 0x336   :  { %v669_v59 = vor.u32 1.1754944e-38, %v668_v3 }
 0x337   :  { %1414 = vst [vmem:[%s2982_s5 + $0x28] sm:$0xff] %v1398_v23  ;;  %v660_v34 = vmul.f32 %v2842_v60, %v659_v50  ;;  %v539_v44 = vsel %vm2889_vm7, %v2819_v35, %v535_v19  ;;  %v549_v35 = vadd.f32 %v2839_v31, %v548_v2  ;;  %v444_v50 = vpop.f32.mrf.mxu2 }
 0x339   :  { %v1326_v13 = vpop.permute.xlu0 %1325  ;;  %v661_v47 = vadd.f32 %v2842_v60, %v660_v34  ;;  %v553_v6 = vsel %vm2922_vm0, %v2839_v31, %v549_v35 }
 0x33a   :  { %v1365_v27 = vsel %vm1355_vm10, %v680_v16, %v1326_v13  ;;  %v1336_v21 = vpop.permute.xlu2 %1335  ;;  %v506_v16 = vmul.f32 %v2811_v39, %v505_v62  ;;  %v599_v13 = vor.u32 1.1754944e-38, %v598_v25 }
 0x33b   :  { %v1382_v10 = vsel %vm1372_vm11, %v1365_v27, 0.0  ;;  %v1370_v22 = vsel %vm1355_vm10, %v685_v54, %v1336_v21 }
 0x33c   :  { %v1402_v51 = vadd.f32 %v2650_v36, %v1382_v10  ;;  %v1387_v49 = vsel %vm1372_vm11, %v1370_v22, 0.0  ;;  %v600_v27 = vsel %vm597_vm15, %v599_v13, %v595_v40  ;;  %v507_v52 = vadd.f32 %v2811_v39, %v506_v16  ;;  %vm2930_vm15 = vmor %vm662_vm1, %vm663_vm13 }
 0x33d   :  { %v1407_v33 = vadd.f32 %v2650_v36, %v1387_v49  ;;  %v542_v10 = vand.u32 2147483648, %v2476_v48  ;;  %v681_v26 = vmul.f32 %v600_v27, %v2688_v57  ;;  %v665_v1 = vsel %vm2930_vm15, %v2842_v60, %v661_v47 }
 0x33e   :  { %1418 = vst [vmem:[%s2982_s5 + $0x48] sm:$0xff] %v1402_v51  ;;  %v540_v51 = vand.u32 2147483647, %v2476_v48  ;;  %v511_v57 = vsel %vm2880_vm5, %v2811_v39, %v507_v52  ;;  %v631_v39 = vsub.f32 1.0, %v630_v56  ;;  %v670_v13 = vsel %vm667_vm2, %v669_v59, %v665_v1 }
 0x33f   :  { %1423 = vst [vmem:[%s2982_s5 + $0x70] sm:$0xff] %v1407_v33  ;;  %v543_v28 = vor.u32 1.1754944e-38, %v542_v10  ;;  %vm634_vm5 = vweird.f32 %v2626_v32  ;;  %v638_v27 = vand.u32 2147483647, %v2626_v32  ;;  %v686_v58 = vmul.f32 %v670_v13, %v444_v50 }
 0x340   :  { %vm541_vm9 = vcmp.eq.f32.partialorder %v540_v51, 8.507059e+37  ;;  %v632_v25 = vmul.f32 %v2869_v8, %v631_v39  ;;  %vm636_vm6 = vmor %vm634_vm5, %vm635_vm4  ;;  %v641_v51 = vor.u32 1.1754944e-38, %v640_v14 }
 0x341   :  { %v1314_v55 = vpop.permute.xlu0 %1313  ;;  %vm639_vm7 = vcmp.eq.f32.partialorder %v638_v27, 8.507059e+37 }
 0x342   :  { %v1359_v24 = vsel %vm1355_vm10, %v674_v42, %v1314_v55  ;;  %v515_v55 = vor.u32 1.1754944e-38, %v514_v30  ;;  %v633_v60 = vadd.f32 %v2869_v8, %v632_v25 }
 0x343   :  { %v1376_v15 = vsel %vm1372_vm11, %v1359_v24, 0.0 }
 0x344   :  { %v1396_v41 = vadd.f32 %v2650_v36, %v1376_v15  ;;  %v422_v15 = vpop.f32.mrf.mxu0  ;;  %v516_v33 = vsel %vm513_vm8, %v515_v55, %v511_v57  ;;  %v637_v23 = vsel %vm636_vm6, %v2869_v8, %v633_v60 }
 0x345   :  { %v675_v17 = vmul.f32 %v516_v33, %v2729_v20  ;;  %v557_v20 = vor.u32 1.1754944e-38, %v556_v9  ;;  %v642_v61 = vsel %vm639_vm7, %v641_v51, %v637_v23 }
 0x346   :  { %1412 = vst [vmem:[%s2982_s5 + $0x18] sm:$0xff] %v1396_v41  ;;  %v544_v41 = vsel %vm541_vm9, %v543_v28, %v539_v44  ;;  %v684_v8 = vmul.f32 %v642_v61, %v2762_v46 }
 0x347   :  { %v677_v18 = vmul.f32 %v544_v41, %v422_v15  ;;  %v558_v4 = vsel %vm555_vm3, %v557_v20, %v553_v6 }
 0x34c   :  { %v424_v31 = vpop.f32.mrf.mxu0 }
 0x34d   :  { %v678_v52 = vmul.f32 %v558_v4, %v424_v31 }
 0x34e   :  { %v1328_v54 = vpop.permute.xlu1 %1327  ;;  %v1332_v42 = vpop.permute.xlu0 %1331 }
 0x34f   :  { %v1366_v21 = vsel %vm1355_vm10, %v681_v26, %v1328_v54  ;;  %v1368_v48 = vsel %vm1355_vm10, %v683_v63, %v1332_v42 }
 0x350   :  { %v1383_v53 = vsel %vm1372_vm11, %v1366_v21, 0.0  ;;  %v1385_v22 = vsel %vm1372_vm11, %v1368_v48, 0.0 }
 0x351   :  { %v1403_v24 = vadd.f32 %v2650_v36, %v1383_v53  ;;  %v1405_v49 = vadd.f32 %v2650_v36, %v1385_v22 }
 0x353   :  { %1419 = vst [vmem:[%s2982_s5 + $0x50] sm:$0xff] %v1403_v24 }
 0x354   :  { %1421 = vst [vmem:[%s2982_s5 + $0x60] sm:$0xff] %v1405_v49 }
 0x356   :  { %v1316_v43 = vpop.permute.xlu1 %1315  ;;  %v1320_v5 = vpop.permute.xlu0 %1319 }
 0x357   :  { %v1360_v38 = vsel %vm1355_vm10, %v675_v17, %v1316_v43  ;;  %v1362_v0 = vsel %vm1355_vm10, %v677_v18, %v1320_v5 }
 0x358   :  { %v1377_v16 = vsel %vm1372_vm11, %v1360_v38, 0.0  ;;  %v1379_v12 = vsel %vm1372_vm11, %v1362_v0, 0.0 }
 0x359   :  { %v1397_v40 = vadd.f32 %v2650_v36, %v1377_v16  ;;  %v1399_v11 = vadd.f32 %v2650_v36, %v1379_v12 }
 0x35b   :  { %1413 = vst [vmem:[%s2982_s5 + $0x20] sm:$0xff] %v1397_v40 }
 0x35c   :  { %1415 = vst [vmem:[%s2982_s5 + $0x30] sm:$0xff] %v1399_v11 }
 0x35e   :  { %v1338_v19 = vpop.permute.xlu0 %1337  ;;  %v1322_v7 = vpop.permute.xlu1 %1321 }
 0x35f   :  { %v1371_v30 = vsel %vm1355_vm10, %v686_v58, %v1338_v19  ;;  %v1363_v10 = vsel %vm1355_vm10, %v678_v52, %v1322_v7 }
 0x360   :  { %v1388_v26 = vsel %vm1372_vm11, %v1371_v30, 0.0  ;;  %v1380_v63 = vsel %vm1372_vm11, %v1363_v10, 0.0 }
 0x361   :  { %v1408_v2 = vadd.f32 %v2650_v36, %v1388_v26  ;;  %v1400_v32 = vadd.f32 %v2650_v36, %v1380_v63 }
 0x363   :  { %1424 = vst [vmem:[%s2982_s5 + $0x78] sm:$0xff] %v1408_v2 }
 0x364   :  { %1416 = vst [vmem:[%s2982_s5 + $0x38] sm:$0xff] %v1400_v32 }
 0x366   :  { %v1334_v56 = vpop.permute.xlu1 %1333 }
 0x367   :  { %v1369_v34 = vsel %vm1355_vm10, %v684_v8, %v1334_v56 }
 0x368   :  { %v1386_v54 = vsel %vm1372_vm11, %v1369_v34, 0.0 }
 0x369   :  { %v1406_v42 = vadd.f32 %v2650_v36, %v1386_v54 }
 0x36b   :  { %1422 = vst [vmem:[%s2982_s5 + $0x68] sm:$0xff] %v1406_v42 }

</bundles_post_ra>
